<compile_context>
chip_gen: v5e
topology: v5e:2x2
jax: 0.10.0
libtpu: 0.0.40
codegen_flags: <defaults>
</compile_context>

<pallas_src>
import functools

import jax
import jax.numpy as jnp
from jax.experimental import pallas as pl
from jax.experimental.pallas import tpu as pltpu


# ---------------------------------------------------------------------------
# Wrapper-side (trace-time / one-off) parameter preparation
# ---------------------------------------------------------------------------

def _fold_conv3x3_2x2(w):
    """Fold a 3x3 'same' conv acting on a 2x2 map into a dense matrix.

    w: (3, 3, Cin, K)  ->  (4*Cin, 4*K)
    input flat order  (ih, iw, c)  == NHWC .reshape(P, 4*Cin)
    output flat order (oh, ow, k)  == NHWC .reshape(P, 4*K)
    (For 2x2 in / 2x2 out with pad=1 every (ih, ow) pair maps to a valid tap.)
    """
    cols = []
    for oh in range(2):
        for ow in range(2):
            rows = []
            for ih in range(2):
                for iw in range(2):
                    kh, kw = ih - oh + 1, iw - ow + 1
                    rows.append(w[kh, kw])                 # (Cin, K)
            cols.append(jnp.concatenate(rows, axis=0))     # (4*Cin, K)
    return jnp.concatenate(cols, axis=1)                   # (4*Cin, 4*K)


def pack_relation_params(params):
    """Pack the 14 raw Relation parameters into 5 kernel-friendly arrays."""
    (w1, b1, g1, be1, w2, b2, g2, be2, fw1, fb1, fw2, fb2) = params
    cin2 = w1.shape[2]
    assert cin2 % 2 == 0
    c_emb = cin2 // 2
    h_dim = w1.shape[3]
    assert h_dim >= 8, "packing assumes h_dim >= fc1 width (8)"

    # conv1 folded and split along the channel-concat (query half / proto half)
    wq = _fold_conv3x3_2x2(w1[:, :, :c_emb, :])            # (4C, 4K)
    wp = _fold_conv3x3_2x2(w1[:, :, c_emb:, :])            # (4C, 4K)
    w1f = jnp.concatenate([wq, wp], axis=0).astype(jnp.bfloat16)   # (8C, 4K)

    # conv2 on a 1x1 post-pool map == center tap only
    w2c = w2[1, 1].astype(jnp.bfloat16)                    # (h_dim, h_dim)
    fw1b = fw1.astype(jnp.bfloat16)                        # (h_dim, 8)
    fw2b = fw2.astype(jnp.bfloat16)                        # (8, 1)

    def row(v):
        v = jnp.asarray(v, jnp.float32).reshape(-1)
        return jnp.zeros((h_dim,), jnp.float32).at[: v.shape[0]].set(v)

    # rows: b1, g1, be1, b2, g2, be2, fb1(padded), fb2(padded)
    vecs = jnp.stack([row(b1), row(g1), row(be1),
                      row(b2), row(g2), row(be2),
                      row(fb1), row(fb2)], axis=0)         # (8, h_dim) f32
    return (w1f, w2c, fw1b, fw2b, vecs)


# ---------------------------------------------------------------------------
# Kernel
# ---------------------------------------------------------------------------

def _bn_relu(x, gamma2d, beta2d, axes, eps=1e-5):
    """Training-mode BatchNorm (biased batch stats) + ReLU, one-pass stats."""
    n = 1
    for a in axes:
        n *= x.shape[a]
    inv_n = 1.0 / float(n)
    s = jnp.sum(x, axis=axes, keepdims=True)
    sq = jnp.sum(x * x, axis=axes, keepdims=True)
    mean = s * inv_n
    var = jnp.maximum(sq * inv_n - mean * mean, 0.0)
    k = gamma2d.shape[-1]
    g = gamma2d.reshape((1,) * (x.ndim - 1) + (k,))
    b = beta2d.reshape((1,) * (x.ndim - 1) + (k,))
    y = (x - mean) * jax.lax.rsqrt(var + eps) * g + b
    return jnp.maximum(y, 0.0)


def _relation_kernel(shot, way,
                     sup_ref, qry_ref,
                     w1f_ref, w2c_ref, fw1_ref, fw2_ref, vec_ref,
                     out_ref):
    sup = sup_ref[...]                         # (shot*way, 4C) f32
    qry = qry_ref[...]                         # (nq,       4C) f32
    nq, four_c = qry.shape
    hdim = w2c_ref.shape[0]

    # compute_prototypes: mean over the shot dim
    protos = jnp.mean(sup.reshape(shot, way, four_c), axis=0)      # (way, 4C)

    # packed per-channel vectors
    vecs = vec_ref[...]                        # (8, h_dim) f32
    b1, g1, be1 = vecs[0:1], vecs[1:2], vecs[2:3]
    b2, g2, be2 = vecs[3:4], vecs[4:5], vecs[5:6]
    fb1 = vecs[6:7, :8]                        # (1, 8)
    fb2 = vecs[7:8, 0:1]                       # (1, 1)

    w1f = w1f_ref[...]                         # (8C, 4*h_dim) bf16
    wq = w1f[:four_c, :]
    wp = w1f[four_c:, :]

    # conv1 (folded) using linearity over the channel concat:
    #   conv1(cat(q, proto)) = q @ Wq + proto @ Wp   (bias added after)
    yq = jnp.dot(qry.astype(jnp.bfloat16), wq,
                 preferred_element_type=jnp.float32)               # (nq, 4K)
    yp = jnp.dot(protos.astype(jnp.bfloat16), wp,
                 preferred_element_type=jnp.float32)               # (way, 4K)
    y = (yq.reshape(nq, 1, 4, hdim)
         + yp.reshape(1, way, 4, hdim)
         + b1[None, None])                                         # (nq,way,4,K)

    # BN1 (batch stats over N and the 4 spatial positions) + ReLU
    y = _bn_relu(y, g1, be1, axes=(0, 1, 2))
    # MaxPool2d(2,2) on a 2x2 map == max over the 4 spatial positions
    x = jnp.max(y, axis=2).reshape(nq * way, hdim)                 # (P, K)

    # conv2 on a 1x1 map == center-tap matmul, then BN2 + ReLU
    x = jnp.dot(x.astype(jnp.bfloat16), w2c_ref[...],
                preferred_element_type=jnp.float32) + b2
    x = _bn_relu(x, g2, be2, axes=(0,))

    # fc head (flatten is identity: spatial is 1x1)
    h = jnp.dot(x.astype(jnp.bfloat16), fw1_ref[...],
                preferred_element_type=jnp.float32) + fb1
    h = jnp.maximum(h, 0.0)
    logits = jnp.dot(h.astype(jnp.bfloat16), fw2_ref[...],
                     preferred_element_type=jnp.float32) + fb2     # (P, 1)
    out_ref[...] = jax.nn.sigmoid(logits).reshape(nq, way)


# ---------------------------------------------------------------------------
# Public wrapper
# ---------------------------------------------------------------------------

@functools.partial(jax.jit, static_argnames=("shot", "way"))
def rn_relation_forward(support_emb, query_emb, packed, *, shot, way):
    """support_emb: (shot*way, H, W, C), query_emb: (nq, H, W, C) -> (nq, way)."""
    n_s, H, W, C = support_emb.shape
    nq = query_emb.shape[0]
    # Relation requires fc1.in_features == h_dim (z_dim == h_dim), i.e. the
    # post-pool map is 1x1 => the embedding spatial extent must be 2x2.
    assert (H, W) == (2, 2), "Relation head requires 2x2 spatial embeddings"
    assert n_s == shot * way

    sup2d = support_emb.reshape(shot * way, H * W * C).astype(jnp.float32)
    qry2d = query_emb.reshape(nq, H * W * C).astype(jnp.float32)

    kernel = functools.partial(_relation_kernel, shot, way)
    n_in = 2 + len(packed)
    return pl.pallas_call(
        kernel,
        out_shape=jax.ShapeDtypeStruct((nq, way), jnp.float32),
        in_specs=[pl.BlockSpec(memory_space=pltpu.MemorySpace.VMEM)] * n_in,
        out_specs=pl.BlockSpec(memory_space=pltpu.MemorySpace.VMEM),
    )(sup2d, qry2d, *packed)


# ---------------------------------------------------------------------------
# Synthetic parameters (PyTorch-equivalent shapes, scaled down)
# ---------------------------------------------------------------------------

def init_relation_params(key, c_emb, h_dim):
    ks = jax.random.split(key, 8)
    in_dim = 2 * c_emb
    w1 = jax.random.normal(ks[0], (3, 3, in_dim, h_dim), jnp.float32) * 0.1
    b1 = jax.random.normal(ks[1], (1, h_dim), jnp.float32) * 0.1
    g1 = jnp.ones((1, h_dim), jnp.float32)      # BatchNorm2d default init
    be1 = jnp.zeros((1, h_dim), jnp.float32)
    w2 = jax.random.normal(ks[2], (3, 3, h_dim, h_dim), jnp.float32) * 0.1
    b2 = jax.random.normal(ks[3], (1, h_dim), jnp.float32) * 0.1
    g2 = jnp.ones((1, h_dim), jnp.float32)
    be2 = jnp.zeros((1, h_dim), jnp.float32)
    fw1 = jax.random.normal(ks[4], (h_dim, 8), jnp.float32) * 0.1
    fb1 = jax.random.normal(ks[5], (1, 8), jnp.float32) * 0.1
    fw2 = jax.random.normal(ks[6], (8, 1), jnp.float32) * 0.1
    fb2 = jax.random.normal(ks[7], (1, 1), jnp.float32) * 0.1
    return (w1, b1, g1, be1, w2, b2, g2, be2, fw1, fb1, fw2, fb2)


if __name__ == "__main__":
    key = jax.random.PRNGKey(0)
    k_sup, k_qry, k_par = jax.random.split(key, 3)

    # small few-shot episode: 5-way, 2-shot, 2 queries per class
    way, shot, query = 5, 2, 2
    C, H, W = 8, 2, 2          # embedding channels / spatial (spatial must be 2x2)
    h_dim = 16                 # scaled-down h_dim == z_dim

    support_emb = jax.random.normal(k_sup, (shot * way, H, W, C), jnp.float32)
    query_emb = jax.random.normal(k_qry, (way * query, H, W, C), jnp.float32)
    params = init_relation_params(k_par, C, h_dim)
    packed = pack_relation_params(params)      # one-off fold / pack of weights

    out = rn_relation_forward(support_emb, query_emb, packed, shot=shot, way=way)
    out = jax.block_until_ready(out)

    assert out.shape == (way * query, way)
    assert bool(jnp.all(jnp.isfinite(out)))
    assert bool(jnp.all((out >= 0.0) & (out <= 1.0)))   # sigmoid outputs
    print("KERNEL_OK")
</pallas_src>

<mosaic_0001>
module attributes {stable_mosaic.version = 11 : i64} {
  func.func @_relation_kernel(%arg0: memref<10x32xf32, #tpu.memory_space<vmem>>, %arg1: memref<10x32xf32, #tpu.memory_space<vmem>>, %arg2: memref<64x64xbf16, #tpu.memory_space<vmem>>, %arg3: memref<16x16xbf16, #tpu.memory_space<vmem>>, %arg4: memref<16x8xbf16, #tpu.memory_space<vmem>>, %arg5: memref<8x1xbf16, #tpu.memory_space<vmem>>, %arg6: memref<8x16xf32, #tpu.memory_space<vmem>>, %arg7: memref<10x5xf32, #tpu.memory_space<vmem>>) attributes {dimension_semantics = [], scalar_prefetch = 0 : i64, scratch_operands = 0 : i64, tpu.core_type = #tpu.core_type<tc>} {
    %c0 = arith.constant 0 : index
    %c0_0 = arith.constant 0 : index
    %0 = vector.load %arg0[%c0, %c0_0] : memref<10x32xf32, #tpu.memory_space<vmem>>, vector<10x32xf32>
    %c0_1 = arith.constant 0 : index
    %c0_2 = arith.constant 0 : index
    %1 = vector.load %arg1[%c0_1, %c0_2] : memref<10x32xf32, #tpu.memory_space<vmem>>, vector<10x32xf32>
    %2 = vector.shape_cast %0 : vector<10x32xf32> to vector<2x5x32xf32>
    %cst = arith.constant dense<0.000000e+00> : vector<5x32xf32>
    %3 = vector.multi_reduction <add>, %2, %cst [0] : vector<2x5x32xf32> to vector<5x32xf32>
    %cst_3 = arith.constant 2.000000e+00 : f32
    %4 = vector.broadcast %cst_3 : f32 to vector<5x32xf32>
    %5 = arith.divf %3, %4 : vector<5x32xf32>
    %c0_4 = arith.constant 0 : index
    %c0_5 = arith.constant 0 : index
    %6 = vector.load %arg6[%c0_4, %c0_5] : memref<8x16xf32, #tpu.memory_space<vmem>>, vector<8x16xf32>
    %7 = vector.extract_strided_slice %6 {offsets = [0, 0], sizes = [1, 16], strides = [1, 1]} : vector<8x16xf32> to vector<1x16xf32>
    %8 = vector.extract_strided_slice %6 {offsets = [1, 0], sizes = [1, 16], strides = [1, 1]} : vector<8x16xf32> to vector<1x16xf32>
    %9 = vector.extract_strided_slice %6 {offsets = [2, 0], sizes = [1, 16], strides = [1, 1]} : vector<8x16xf32> to vector<1x16xf32>
    %10 = vector.extract_strided_slice %6 {offsets = [3, 0], sizes = [1, 16], strides = [1, 1]} : vector<8x16xf32> to vector<1x16xf32>
    %11 = vector.extract_strided_slice %6 {offsets = [4, 0], sizes = [1, 16], strides = [1, 1]} : vector<8x16xf32> to vector<1x16xf32>
    %12 = vector.extract_strided_slice %6 {offsets = [5, 0], sizes = [1, 16], strides = [1, 1]} : vector<8x16xf32> to vector<1x16xf32>
    %13 = vector.extract_strided_slice %6 {offsets = [6, 0], sizes = [1, 8], strides = [1, 1]} : vector<8x16xf32> to vector<1x8xf32>
    %14 = vector.extract_strided_slice %6 {offsets = [7, 0], sizes = [1, 1], strides = [1, 1]} : vector<8x16xf32> to vector<1x1xf32>
    %c0_6 = arith.constant 0 : index
    %c0_7 = arith.constant 0 : index
    %15 = vector.load %arg2[%c0_6, %c0_7] : memref<64x64xbf16, #tpu.memory_space<vmem>>, vector<64x64xbf16>
    %16 = vector.extract_strided_slice %15 {offsets = [0, 0], sizes = [32, 64], strides = [1, 1]} : vector<64x64xbf16> to vector<32x64xbf16>
    %17 = vector.extract_strided_slice %15 {offsets = [32, 0], sizes = [32, 64], strides = [1, 1]} : vector<64x64xbf16> to vector<32x64xbf16>
    %18 = arith.truncf %1 : vector<10x32xf32> to vector<10x32xbf16>
    %cst_8 = arith.constant dense<0.000000e+00> : vector<10x64xf32>
    %19 = tpu.matmul %18, %16, %cst_8 {dimension_numbers = #tpu.dot_dimension_numbers<[1], [0], [0], [1], [0, 0, 1, 1], [], []>} : vector<10x32xbf16>, vector<32x64xbf16>, vector<10x64xf32> -> vector<10x64xf32>
    %20 = arith.truncf %5 : vector<5x32xf32> to vector<5x32xbf16>
    %cst_9 = arith.constant dense<0.000000e+00> : vector<5x64xf32>
    %21 = tpu.matmul %20, %17, %cst_9 {dimension_numbers = #tpu.dot_dimension_numbers<[1], [0], [0], [1], [0, 0, 1, 1], [], []>} : vector<5x32xbf16>, vector<32x64xbf16>, vector<5x64xf32> -> vector<5x64xf32>
    %22 = vector.shape_cast %19 : vector<10x64xf32> to vector<10x1x4x16xf32>
    %23 = vector.shape_cast %21 : vector<5x64xf32> to vector<1x5x4x16xf32>
    %24 = vector.broadcast %22 : vector<10x1x4x16xf32> to vector<10x5x4x16xf32>
    %25 = vector.broadcast %23 : vector<1x5x4x16xf32> to vector<10x5x4x16xf32>
    %26 = arith.addf %24, %25 : vector<10x5x4x16xf32>
    %27 = vector.shape_cast %7 : vector<1x16xf32> to vector<1x1x1x16xf32>
    %28 = vector.broadcast %27 : vector<1x1x1x16xf32> to vector<10x5x4x16xf32>
    %29 = arith.addf %26, %28 : vector<10x5x4x16xf32>
    %cst_10 = arith.constant dense<0.000000e+00> : vector<16xf32>
    %30 = vector.multi_reduction <add>, %29, %cst_10 [0, 1, 2] : vector<10x5x4x16xf32> to vector<16xf32>
    %31 = vector.shape_cast %30 : vector<16xf32> to vector<1x1x1x16xf32>
    %32 = arith.mulf %29, %29 : vector<10x5x4x16xf32>
    %cst_11 = arith.constant dense<0.000000e+00> : vector<16xf32>
    %33 = vector.multi_reduction <add>, %32, %cst_11 [0, 1, 2] : vector<10x5x4x16xf32> to vector<16xf32>
    %34 = vector.shape_cast %33 : vector<16xf32> to vector<1x1x1x16xf32>
    %cst_12 = arith.constant 5.000000e-03 : f32
    %35 = vector.broadcast %cst_12 : f32 to vector<1x1x1x16xf32>
    %36 = arith.mulf %31, %35 : vector<1x1x1x16xf32>
    %cst_13 = arith.constant 5.000000e-03 : f32
    %37 = vector.broadcast %cst_13 : f32 to vector<1x1x1x16xf32>
    %38 = arith.mulf %34, %37 : vector<1x1x1x16xf32>
    %39 = arith.mulf %36, %36 : vector<1x1x1x16xf32>
    %40 = arith.subf %38, %39 : vector<1x1x1x16xf32>
    %cst_14 = arith.constant 0.000000e+00 : f32
    %41 = vector.broadcast %cst_14 : f32 to vector<1x1x1x16xf32>
    %42 = arith.maximumf %40, %41 : vector<1x1x1x16xf32>
    %43 = vector.shape_cast %8 : vector<1x16xf32> to vector<1x1x1x16xf32>
    %44 = vector.shape_cast %9 : vector<1x16xf32> to vector<1x1x1x16xf32>
    %45 = vector.broadcast %36 : vector<1x1x1x16xf32> to vector<10x5x4x16xf32>
    %46 = arith.subf %29, %45 : vector<10x5x4x16xf32>
    %cst_15 = arith.constant 9.99999974E-6 : f32
    %47 = vector.broadcast %cst_15 : f32 to vector<1x1x1x16xf32>
    %48 = arith.addf %42, %47 : vector<1x1x1x16xf32>
    %49 = math.rsqrt %48 : vector<1x1x1x16xf32>
    %50 = vector.broadcast %49 : vector<1x1x1x16xf32> to vector<10x5x4x16xf32>
    %51 = arith.mulf %46, %50 : vector<10x5x4x16xf32>
    %52 = vector.broadcast %43 : vector<1x1x1x16xf32> to vector<10x5x4x16xf32>
    %53 = arith.mulf %51, %52 : vector<10x5x4x16xf32>
    %54 = vector.broadcast %44 : vector<1x1x1x16xf32> to vector<10x5x4x16xf32>
    %55 = arith.addf %53, %54 : vector<10x5x4x16xf32>
    %cst_16 = arith.constant 0.000000e+00 : f32
    %56 = vector.broadcast %cst_16 : f32 to vector<10x5x4x16xf32>
    %57 = arith.maximumf %55, %56 : vector<10x5x4x16xf32>
    %cst_17 = arith.constant dense<0xFF800000> : vector<10x5x16xf32>
    %58 = vector.multi_reduction <maximumf>, %57, %cst_17 [2] : vector<10x5x4x16xf32> to vector<10x5x16xf32>
    %59 = vector.shape_cast %58 : vector<10x5x16xf32> to vector<50x16xf32>
    %60 = arith.truncf %59 : vector<50x16xf32> to vector<50x16xbf16>
    %c0_18 = arith.constant 0 : index
    %c0_19 = arith.constant 0 : index
    %61 = vector.load %arg3[%c0_18, %c0_19] : memref<16x16xbf16, #tpu.memory_space<vmem>>, vector<16x16xbf16>
    %cst_20 = arith.constant dense<0.000000e+00> : vector<50x16xf32>
    %62 = tpu.matmul %60, %61, %cst_20 {dimension_numbers = #tpu.dot_dimension_numbers<[1], [0], [0], [1], [0, 0, 1, 1], [], []>} : vector<50x16xbf16>, vector<16x16xbf16>, vector<50x16xf32> -> vector<50x16xf32>
    %63 = vector.broadcast %10 : vector<1x16xf32> to vector<50x16xf32>
    %64 = arith.addf %62, %63 : vector<50x16xf32>
    %cst_21 = arith.constant dense<0.000000e+00> : vector<16xf32>
    %65 = vector.multi_reduction <add>, %64, %cst_21 [0] : vector<50x16xf32> to vector<16xf32>
    %66 = vector.shape_cast %65 : vector<16xf32> to vector<1x16xf32>
    %67 = arith.mulf %64, %64 : vector<50x16xf32>
    %cst_22 = arith.constant dense<0.000000e+00> : vector<16xf32>
    %68 = vector.multi_reduction <add>, %67, %cst_22 [0] : vector<50x16xf32> to vector<16xf32>
    %69 = vector.shape_cast %68 : vector<16xf32> to vector<1x16xf32>
    %cst_23 = arith.constant 2.000000e-02 : f32
    %70 = vector.broadcast %cst_23 : f32 to vector<1x16xf32>
    %71 = arith.mulf %66, %70 : vector<1x16xf32>
    %cst_24 = arith.constant 2.000000e-02 : f32
    %72 = vector.broadcast %cst_24 : f32 to vector<1x16xf32>
    %73 = arith.mulf %69, %72 : vector<1x16xf32>
    %74 = arith.mulf %71, %71 : vector<1x16xf32>
    %75 = arith.subf %73, %74 : vector<1x16xf32>
    %cst_25 = arith.constant 0.000000e+00 : f32
    %76 = vector.broadcast %cst_25 : f32 to vector<1x16xf32>
    %77 = arith.maximumf %75, %76 : vector<1x16xf32>
    %78 = vector.broadcast %71 : vector<1x16xf32> to vector<50x16xf32>
    %79 = arith.subf %64, %78 : vector<50x16xf32>
    %cst_26 = arith.constant 9.99999974E-6 : f32
    %80 = vector.broadcast %cst_26 : f32 to vector<1x16xf32>
    %81 = arith.addf %77, %80 : vector<1x16xf32>
    %82 = math.rsqrt %81 : vector<1x16xf32>
    %83 = vector.broadcast %82 : vector<1x16xf32> to vector<50x16xf32>
    %84 = arith.mulf %79, %83 : vector<50x16xf32>
    %85 = vector.broadcast %11 : vector<1x16xf32> to vector<50x16xf32>
    %86 = arith.mulf %84, %85 : vector<50x16xf32>
    %87 = vector.broadcast %12 : vector<1x16xf32> to vector<50x16xf32>
    %88 = arith.addf %86, %87 : vector<50x16xf32>
    %cst_27 = arith.constant 0.000000e+00 : f32
    %89 = vector.broadcast %cst_27 : f32 to vector<50x16xf32>
    %90 = arith.maximumf %88, %89 : vector<50x16xf32>
    %91 = arith.truncf %90 : vector<50x16xf32> to vector<50x16xbf16>
    %c0_28 = arith.constant 0 : index
    %c0_29 = arith.constant 0 : index
    %92 = vector.load %arg4[%c0_28, %c0_29] : memref<16x8xbf16, #tpu.memory_space<vmem>>, vector<16x8xbf16>
    %cst_30 = arith.constant dense<0.000000e+00> : vector<50x8xf32>
    %93 = tpu.matmul %91, %92, %cst_30 {dimension_numbers = #tpu.dot_dimension_numbers<[1], [0], [0], [1], [0, 0, 1, 1], [], []>} : vector<50x16xbf16>, vector<16x8xbf16>, vector<50x8xf32> -> vector<50x8xf32>
    %94 = vector.broadcast %13 : vector<1x8xf32> to vector<50x8xf32>
    %95 = arith.addf %93, %94 : vector<50x8xf32>
    %cst_31 = arith.constant 0.000000e+00 : f32
    %96 = vector.broadcast %cst_31 : f32 to vector<50x8xf32>
    %97 = arith.maximumf %95, %96 : vector<50x8xf32>
    %98 = arith.truncf %97 : vector<50x8xf32> to vector<50x8xbf16>
    %c0_32 = arith.constant 0 : index
    %c0_33 = arith.constant 0 : index
    %99 = vector.load %arg5[%c0_32, %c0_33] : memref<8x1xbf16, #tpu.memory_space<vmem>>, vector<8x1xbf16>
    %cst_34 = arith.constant dense<0.000000e+00> : vector<50x1xf32>
    %100 = tpu.matmul %98, %99, %cst_34 {dimension_numbers = #tpu.dot_dimension_numbers<[1], [0], [0], [1], [0, 0, 1, 1], [], []>} : vector<50x8xbf16>, vector<8x1xbf16>, vector<50x1xf32> -> vector<50x1xf32>
    %101 = vector.broadcast %14 : vector<1x1xf32> to vector<50x1xf32>
    %102 = arith.addf %100, %101 : vector<50x1xf32>
    %103 = arith.negf %102 : vector<50x1xf32>
    %104 = math.exp %103 : vector<50x1xf32>
    %cst_35 = arith.constant 1.000000e+00 : f32
    %105 = vector.broadcast %cst_35 : f32 to vector<50x1xf32>
    %106 = arith.addf %105, %104 : vector<50x1xf32>
    %107 = arith.divf %105, %106 : vector<50x1xf32>
    %108 = vector.shape_cast %107 : vector<50x1xf32> to vector<10x5xf32>
    %c0_36 = arith.constant 0 : index
    %c0_37 = arith.constant 0 : index
    %109 = vector.load %arg7[%c0_36, %c0_37] : memref<10x5xf32, #tpu.memory_space<vmem>>, vector<10x5xf32>
    tpu.vector_store %arg7[%c0_36, %c0_37], %108 {strides = array<i32>} : memref<10x5xf32, #tpu.memory_space<vmem>>, vector<10x5xf32>,
    return
  }
}

</mosaic_0001>

<bundles_post_ra>
// kernel: rn_relation_forward.1
= control target key start
LH: loop header
LB: loop body
LE: loop exit
PB: predicated region body
PF: predicated region fallthrough
CT: control target
= control target key end

     0   :  { %v2140_v9 = vmov 2.0   ;;  %vm93_vm0 = vcmask 261120   ;;  %vm59_vm1 = vcmask 258048   ;;  %s2143_s16 = smov 80   ;;  %v2144_v36 = vmov 1983009808   ;;  %s3435_s2 = inlined_call_operand.vmem [shape: bf16[64,64], index: 2, kind: input, shape index: {}]   ;;  %s3436_s1 = inlined_call_operand.vmem [shape: f32[10,32], index: 1, kind: input, shape index: {}]   ;;  %s3437_s0 = inlined_call_operand.vmem [shape: f32[10,32], index: 0, kind: input, shape index: {}]   ;;  %s3438_s6 = inlined_call_operand.vmem [shape: f32[8,16], index: 6, kind: input, shape index: {}]   ;;  %s3439_s3 = inlined_call_operand.vmem [shape: bf16[16,16], index: 3, kind: input, shape index: {}]   ;;  %s3440_s4 = inlined_call_operand.vmem [shape: bf16[16,8], index: 4, kind: input, shape index: {}]   ;;  %s3441_s5 = inlined_call_operand.vmem [shape: bf16[8,1], index: 5, kind: input, shape index: {}]   ;;  %s3442_s7 = inlined_call_operand.vmem [shape: f32[10,5], index: 7, kind: output, shape index: {}]  }
   0x1   :  { %v2090_v0 = vld [vmem:[%s3435_s2 + $0x8] sm:$0xff]  ;;  %v2089_v1 = vld [vmem:[%s3435_s2] sm:$0xff]  ;;  %v2092_v5 = vld [vmem:[%s3435_s2 + $0x18] sm:$0xff]  ;;  %2105 = vrcp.f32 %v2140_v9  ;;  %v166_v37 = vunpack.c.l.s4 %v2144_v36  ;;  %vm161_vm3 = vcmask 1047556   ;;  %v2145_v46 = vmov 1934713408  }
   0x2   :  { %103 = vmatpush.bf16.msra.mxu1 %v2090_v0  ;;  %v29_v2 = vld [vmem:[%s3436_s1] sm:$0xff]  ;;  %v30_v3 = vld [vmem:[%s3436_s1 + $0x8] sm:$0x3]  ;;  %v2091_v12 = vld [vmem:[%s3435_s2 + $0x10] sm:$0xff]  ;;  %s2142_s2 = smov 96   ;;  %v190_v47 = vunpack.c.l.s4 %v2145_v46  ;;  %vm394_vm4 = vcmask 125952  }
   0x3   :  { %v27_v4 = vld [vmem:[%s3437_s0] sm:$0xff]  ;;  %v80_v11 = vpack.c.bf16 %v30_v3, %v29_v2  ;;  %v28_v16 = vld [vmem:[%s3437_s0 + $0x8] sm:$0x3]  ;;  %s2141_s0 = smov 112   ;;  %v2224_v43 = vunpack.c.0.s8 %v166_v37  ;;  %vm1426_vm8 = vcmask 1041409   ;;  %vm1428_vm9 = vcmask 1042434  }
   0x4   :  { %v33_v6 = vrot.slane %v27_v4, 1  ;;  %v34_v7 = vrot.slane %v27_v4, 2  ;;  %v35_v8 = vrot.slane %v27_v4, 3  ;;  %41 = vst [vmem:[#allocation1] ss:$9 sm:$0xff] %v27_v4  ;;  %v36_v10 = vrot.slane %v27_v4, 4 }
   0x5   :  { %v37_v14 = vrot.slane %v27_v4, 5  ;;  %v38_v17 = vrot.slane %v27_v4, 6  ;;  %v39_v18 = vrot.slane %v27_v4, 7  ;;  %v40_v20 = vrot.slane %v28_v16, 1 }
   0x6   :  { %43 = vst [vmem:[#allocation1 + $0x1] ss:$9 sm:$0xff] %v33_v6  ;;  %104 = vmatpush.bf16.msra.mxu1 %v2089_v1  ;;  %v2232_v54 = vunpack.c.0.s8 %v190_v47  ;;  %vm1430_vm10 = vcmask 1043459   ;;  %vm1432_vm11 = vcmask 1044484   ;;  %vm1434_vm12 = vcmask 1045509  }
   0x7   :  { %45 = vst [vmem:[#allocation1 + $0x2] ss:$9 sm:$0xff] %v34_v7  ;;  %v2106_v13 = vpop.eup %2105  ;;  %vm1436_vm13 = vcmask 1046534   ;;  %vm1438_vm14 = vcmask 1047559   ;;  %vm1486_vm15 = vcmask 130048  }
   0x8   :  { %47 = vst [vmem:[#allocation1 + $0x3] ss:$9 sm:$0xff] %v35_v8  ;;  %v64_v15 = vmul.f32 2.0, %v2106_v13  ;;  %vm68_vm2 = vweird.f32 %v2106_v13 }
   0x9   :  { %49 = vst [vmem:[#allocation1 + $0x4] ss:$9 sm:$0xff] %v36_v10  ;;  %2052 = vmatmul.msk.bf16.vlgmr.msra.gmra.mxu1 %vm93_vm0, %v80_v11  ;;  %v2255_v10 = vld [vmem:[%s3438_s6] sm:$0xff] }
   0xa   :  { %133 = vmatpush.bf16.msrb.mxu1 %v2092_v5  ;;  %v65_v21 = vsub.f32 1.0, %v64_v15  ;;  %3471 = vst [vmem:[#allocation2_spill] sm:$0xff] %v2255_v10 }
   0xc   :  { %v66_v22 = vmul.f32 %v2106_v13, %v65_v21 }
   0xe   :  { %134 = vmatpush.bf16.msrb.mxu1 %v2091_v12  ;;  %v67_v23 = vadd.f32 %v2106_v13, %v66_v22 }
  0x10   :  { %v50_v19 = vld [vmem:[#allocation1] sm:$0xff]  ;;  %v69_v27 = vsel %vm68_vm2, %v2106_v13, %v67_v23 }
  0x11   :  { %51 = vst [vmem:[#allocation1] ss:$9 sm:$0xff] %v37_v14  ;;  %v60_v24 = vsel %vm59_vm1, %v50_v19, 0.0 }
  0x12   :  { %52 = vst [vmem:[#allocation1 + $0x1] ss:$9 sm:$0xff] %v38_v17 }
  0x13   :  { %53 = vst [vmem:[#allocation1 + $0x2] ss:$9 sm:$0xff] %v39_v18  ;;  %v2268_v18 = vperm.slane %v2255_v10, 0 }
  0x14   :  { %54 = vst [vmem:[#allocation1 + $0x3] ss:$9 sm:$0xff] %v28_v16 }
  0x15   :  { %55 = vst [vmem:[#allocation1 + $0x4] ss:$9 sm:$0xff] %v40_v20 }
  0x1c   :  { %v56_v25 = vld [vmem:[#allocation1] sm:$0xff] }
  0x1d   :  { %v61_v26 = vsel %vm59_vm1, %v56_v25, 0.0 }
  0x1e   :  { %v62_v28 = vadd.f32 %v61_v26, %v60_v24 }
  0x20   :  { %v70_v29 = vmul.f32 %v69_v27, %v62_v28 }
  0x22   :  { %v111_v30 = vpack.c.bf16 %v70_v29, %v70_v29 }
  0x24   :  { %2061 = vmatmul.msk.bf16.vlgmr.msrb.gmra.mxu1 %vm93_vm0, %v111_v30  ;;  %vm1538_vm0 = vcmask 123904  }
  0x86   :  { %v2213_v31 = vpop.f32.mrf.mxu1 }
  0x87   :  { %142 = vrot.lane.b32.xlu2 %v2213_v31, %s2141_s0  ;;  %v163_v41 = vrot.slane %v2213_v31, 4 }
  0x8e   :  { %v2217_v32 = vpop.f32.mrf.mxu1 }
  0x8f   :  { %148 = vrot.lane.b32.xlu2 %v2213_v31, %s2142_s2 }
  0x97   :  { %150 = vrot.lane.b32.xlu2 %v2217_v32, %s2142_s2 }
  0xa1   :  { %v136_v33 = vpop.f32.mrf.mxu1 }
  0xa2   :  { %241 = vrot.lane.b32.xlu1 %v136_v33, %s2142_s2  ;;  %244 = vrot.lane.b32.xlu0 %v136_v33, %s2143_s16  ;;  %v249_v62 = vrot.slane %v136_v33, 4 }
  0xa9   :  { %v138_v34 = vpop.f32.mrf.mxu1 }
  0xaa   :  { %154 = vrot.lane.b32.xlu1 %v2213_v31, %s2143_s16  ;;  %238 = vrot.lane.b32.xlu0 %v136_v33, %s2141_s0 }
  0xb2   :  { %144 = vrot.lane.b32.xlu1 %v2217_v32, %s2141_s0  ;;  %156 = vrot.lane.b32.xlu0 %v2217_v32, %s2143_s16 }
  0xe1   :  { %v143_v35 = vpop.permute.xlu2 %142 }
  0xe2   :  { %v175_v49 = vrot.slane %v143_v35, 4 }
  0xe9   :  { %v149_v38 = vpop.permute.xlu2 %148 }
  0xea   :  { %v164_v44 = vsel %vm161_vm3, %v149_v38, %v163_v41  ;;  %v160_v8 = vrot.slane %v149_v38, 4 }
  0xeb   :  { %v2229_v48 = vperm.slane %v164_v44, %v2224_v43 }
  0xec   :  { %v162_v23 = vsel %vm161_vm3, %v160_v8, %v2213_v31 }
  0xed   :  { %v199_v58 = vrot.slane %v2229_v48, 4  ;;  %v168_v28 = vperm.slane %v162_v23, %v2224_v43 }
 0x114   :  { %v242_v39 = vpop.permute.xlu1 %241  ;;  %v245_v40 = vpop.permute.xlu0 %244 }
 0x115   :  { %v247_v42 = vrot.slane %v242_v39, 4  ;;  %v259_v51 = vrot.slane %v245_v40, 4  ;;  %v250_v3 = vsel %vm161_vm3, %v242_v39, %v249_v62 }
 0x116   :  { %v258_v12 = vperm.slane %v250_v3, %v2224_v43 }
 0x117   :  { %v248_v45 = vsel %vm161_vm3, %v247_v42, %v136_v33 }
 0x118   :  { %v254_v50 = vperm.slane %v248_v45, %v2224_v43 }
 0x11a   :  { %v273_v63 = vrot.slane %v254_v50, 4 }
 0x11c   :  { %v155_v52 = vpop.permute.xlu1 %154  ;;  %v239_v53 = vpop.permute.xlu0 %238 }
 0x11d   :  { %v176_v55 = vsel %vm161_vm3, %v155_v52, %v175_v49  ;;  %v260_v56 = vsel %vm161_vm3, %v259_v51, %v239_v53  ;;  %v261_v57 = vrot.slane %v239_v53, 4  ;;  %v173_v59 = vrot.slane %v155_v52, 4  ;;  %v151_v51 = vpop.permute.xlu2 %150 }
 0x11e   :  { %v2238_v60 = vperm.slane %v176_v55, %v2224_v43  ;;  %v266_v61 = vperm.slane %v260_v56, %v2224_v43  ;;  %v187_v56 = vrot.slane %v168_v28, 4 }
 0x11f   :  { %v262_v0 = vsel %vm161_vm3, %v245_v40, %v261_v57  ;;  %v174_v7 = vsel %vm161_vm3, %v173_v59, %v143_v35  ;;  %v217_v57 = vrot.slane %v151_v51, 4 }
 0x120   :  { %v200_v1 = vsel %vm161_vm3, %v2238_v60, %v199_v58  ;;  %v270_v2 = vperm.slane %v262_v0, %v2224_v43  ;;  %v271_v5 = vrot.slane %v266_v61, 4  ;;  %v274_v6 = vsel %vm161_vm3, %v266_v61, %v273_v63 }
 0x121   :  { %v2247_v4 = vperm.slane %v200_v1, %v2232_v54  ;;  %v2263_v14 = vperm.slane %v274_v6, %v2232_v54  ;;  %v180_v16 = vperm.slane %v174_v7, %v2224_v43 }
 0x122   :  { %v272_v11 = vsel %vm161_vm3, %v271_v5, %v254_v50  ;;  %v283_v15 = vrot.slane %v270_v2, 4  ;;  %v218_v2 = vsel %vm161_vm3, %v217_v57, %v2217_v32 }
 0x123   :  { %v215_v9 = vrot.slane %v2247_v4, 4  ;;  %v2260_v13 = vperm.slane %v272_v11, %v2232_v54  ;;  %v185_v26 = vrot.slane %v180_v16, 4  ;;  %v287_v35 = vrot.slane %v2263_v14, 4 }
 0x124   :  { %v284_v19 = vsel %vm161_vm3, %v283_v15, %v258_v12  ;;  %v188_v59 = vsel %vm161_vm3, %v180_v16, %v187_v56  ;;  %v157_v63 = vpop.permute.xlu0 %156  ;;  %v145_v7 = vpop.permute.xlu1 %144 }
 0x125   :  { %v216_v17 = vsel %vm161_vm3, 0.0, %v215_v9  ;;  %v2274_v22 = vperm.slane %v284_v19, %v2232_v54  ;;  %v186_v30 = vsel %vm161_vm3, %v185_v26, %v168_v28  ;;  %v285_v33 = vrot.slane %v2260_v13, 4 }
 0x126   :  { %v328_v20 = vadd.f32 %v2260_v13, %v216_v17  ;;  %v330_v21 = vadd.f32 %v2263_v14, %v216_v17  ;;  %v192_v31 = vperm.slane %v186_v30, %v2232_v54  ;;  %v2299_v38 = vsel %vm161_vm3, 0.0, %v287_v35 }
 0x127   :  { %v332_v27 = vadd.f32 %v2274_v22, %v216_v17  ;;  %v2293_v34 = vsel %vm161_vm3, 0.0, %v285_v33  ;;  %v331_v40 = vadd.f32 %v2299_v38, %v216_v17  ;;  %v2335_v3 = vperm.slane %v188_v59, %v2232_v54 }
 0x128   :  { %v2279_v24 = vadd.f32 %v2268_v18, %v328_v20  ;;  %v2282_v25 = vadd.f32 %v2268_v18, %v330_v21  ;;  %v293_v36 = vadd.f32 %v2260_v13, %v192_v31  ;;  %v294_v37 = vadd.f32 %v2293_v34, %v192_v31 }
 0x129   :  { %v2287_v29 = vadd.f32 %v2268_v18, %v332_v27  ;;  %v329_v39 = vadd.f32 %v2293_v34, %v216_v17  ;;  %v295_v44 = vadd.f32 %v2263_v14, %v192_v31  ;;  %v209_v46 = vrot.slane %v192_v31, 4 }
 0x12a   :  { %3472 = vst [vmem:[#allocation3_spill] sm:$0xff] %v2279_v24  ;;  %v2304_v41 = vadd.f32 %v2268_v18, %v293_v36  ;;  %v2307_v42 = vadd.f32 %v2268_v18, %v294_v37  ;;  %v2314_v47 = vadd.f32 %v2268_v18, %v331_v40  ;;  %v296_v52 = vadd.f32 %v2299_v38, %v192_v31 }
 0x12b   :  { %3473 = vst [vmem:[#allocation4_spill] sm:$0xff] %v2282_v25  ;;  %v2311_v45 = vadd.f32 %v2268_v18, %v329_v39  ;;  %v2322_v53 = vadd.f32 %v2268_v18, %v295_v44  ;;  %v210_v58 = vsel %vm161_vm3, 0.0, %v209_v46  ;;  %v223_v6 = vrot.slane %v157_v63, 4 }
 0x12c   :  { %3474 = vst [vmem:[#allocation5_spill] sm:$0xff] %v2287_v29  ;;  %v395_v49 = vsel %vm394_vm4, %v2304_v41, 0.0  ;;  %v396_v50 = vsel %vm394_vm4, %v2307_v42, 0.0  ;;  %v2327_v61 = vadd.f32 %v2268_v18, %v296_v52  ;;  %v298_v1 = vadd.f32 %v2260_v13, %v210_v58 }
 0x12d   :  { %3475 = vst [vmem:[#allocation6_spill] sm:$0xff] %v2311_v45  ;;  %v397_v55 = vadd.f32 %v396_v50, %v395_v49  ;;  %v398_v62 = vsel %vm394_vm4, %v2322_v53, 0.0  ;;  %v299_v5 = vadd.f32 %v2293_v34, %v210_v58  ;;  %v300_v8 = vadd.f32 %v2263_v14, %v210_v58 }
 0x12e   :  { %3476 = vst [vmem:[#allocation7_spill] sm:$0xff] %v2314_v47  ;;  %v301_v9 = vadd.f32 %v2299_v38, %v210_v58  ;;  %v400_v11 = vsel %vm394_vm4, %v2327_v61, 0.0  ;;  %v297_v12 = vadd.f32 %v2274_v22, %v192_v31  ;;  %v224_v16 = vsel %vm161_vm3, %v223_v6, %v145_v7 }
 0x12f   :  { %v399_v0 = vadd.f32 %v398_v62, %v397_v55  ;;  %v2345_v32 = vadd.f32 %v2268_v18, %v298_v1  ;;  %v228_v17 = vperm.slane %v224_v16, %v2224_v43  ;;  %v222_v20 = vperm.slane %v218_v2, %v2224_v43 }
 0x130   :  { %v2349_v19 = vadd.f32 %v2268_v18, %v297_v12  ;;  %v303_v21 = vadd.f32 %v2260_v13, %v2335_v3  ;;  %v2355_v23 = vadd.f32 %v2268_v18, %v299_v5  ;;  %v2358_v26 = vadd.f32 %v2268_v18, %v300_v8 }
 0x131   :  { %v401_v15 = vadd.f32 %v400_v11, %v399_v0  ;;  %v2361_v27 = vadd.f32 %v2268_v18, %v301_v9  ;;  %v229_v28 = vrot.slane %v228_v17, 4  ;;  %v211_v31 = vrot.slane %v2335_v3, 4 }
 0x132   :  { %3477 = vst [vmem:[#allocation8_spill] sm:$0xff] %v2355_v23  ;;  %v402_v30 = vsel %vm394_vm4, %v2349_v19, 0.0  ;;  %v404_v43 = vsel %vm394_vm4, %v2345_v32, 0.0  ;;  %v302_v36 = vadd.f32 %v2274_v22, %v210_v58  ;;  %v304_v37 = vadd.f32 %v2293_v34, %v2335_v3 }
 0x133   :  { %3478 = vst [vmem:[#allocation9_spill] sm:$0xff] %v2361_v27  ;;  %v403_v33 = vadd.f32 %v402_v30, %v401_v15  ;;  %v230_v35 = vsel %vm161_vm3, %v229_v28, %v222_v20  ;;  %v305_v39 = vadd.f32 %v2263_v14, %v2335_v3  ;;  %v2376_v46 = vadd.f32 %v2268_v18, %v303_v21 }
 0x134   :  { %v234_v40 = vperm.slane %v230_v35, %v2232_v54  ;;  %v406_v49 = vsel %vm394_vm4, %v2355_v23, 0.0  ;;  %v408_v50 = vsel %vm394_vm4, %v2358_v26, 0.0  ;;  %v410_v51 = vsel %vm394_vm4, %v2361_v27, 0.0 }
 0x135   :  { %v405_v44 = vadd.f32 %v404_v43, %v403_v33  ;;  %3479 = vst [vmem:[#allocation10_spill] sm:$0xff] %v2376_v46  ;;  %v2390_v62 = vadd.f32 %v2268_v18, %v302_v36  ;;  %v306_v43 = vadd.f32 %v2299_v38, %v2335_v3  ;;  %v2431_v35 = vadd.f32 %v2268_v18, %v304_v37 }
 0x136   :  { %v235_v52 = vrot.slane %v234_v40, 4  ;;  %v333_v55 = vadd.f32 %v2260_v13, %v234_v40  ;;  %v334_v56 = vadd.f32 %v2293_v34, %v234_v40  ;;  %v335_v57 = vadd.f32 %v2263_v14, %v234_v40 }
 0x137   :  { %v336_v58 = vadd.f32 %v2299_v38, %v234_v40  ;;  %v337_v59 = vadd.f32 %v2274_v22, %v234_v40  ;;  %3480 = vst [vmem:[#allocation11_spill] sm:$0xff] %v2390_v62  ;;  %v407_v63 = vadd.f32 %v406_v49, %v405_v44  ;;  %v412_v36 = vsel %vm394_vm4, %v2390_v62, 0.0 }
 0x138   :  { %v236_v0 = vsel %vm161_vm3, 0.0, %v235_v52  ;;  %v2394_v1 = vadd.f32 %v2268_v18, %v333_v55  ;;  %v2397_v2 = vadd.f32 %v2268_v18, %v334_v56  ;;  %v2400_v5 = vadd.f32 %v2268_v18, %v335_v57 }
 0x139   :  { %v338_v6 = vadd.f32 %v2260_v13, %v236_v0  ;;  %v339_v7 = vadd.f32 %v2293_v34, %v236_v0  ;;  %v340_v8 = vadd.f32 %v2263_v14, %v236_v0  ;;  %v341_v9 = vadd.f32 %v2299_v38, %v236_v0 }
 0x13a   :  { %3481 = vst [vmem:[#allocation12_spill] sm:$0xff] %v2394_v1  ;;  %v342_v11 = vadd.f32 %v2274_v22, %v236_v0  ;;  %v2408_v12 = vadd.f32 %v2268_v18, %v336_v58  ;;  %v2411_v15 = vadd.f32 %v2268_v18, %v337_v59  ;;  %v409_v16 = vadd.f32 %v408_v50, %v407_v63 }
 0x13b   :  { %3482 = vst [vmem:[#allocation13_spill] sm:$0xff] %v2397_v2  ;;  %v2414_v17 = vadd.f32 %v2268_v18, %v338_v6  ;;  %v2417_v20 = vadd.f32 %v2268_v18, %v339_v7  ;;  %v2420_v21 = vadd.f32 %v2268_v18, %v340_v8  ;;  %v2423_v28 = vadd.f32 %v2268_v18, %v341_v9 }
 0x13c   :  { %3483 = vst [vmem:[#allocation14_spill] sm:$0xff] %v2400_v5  ;;  %v2426_v30 = vadd.f32 %v2268_v18, %v342_v11  ;;  %v411_v33 = vadd.f32 %v410_v51, %v409_v16  ;;  %v212_v40 = vsel %vm161_vm3, 0.0, %v211_v31  ;;  %v197_v49 = vrot.slane %v2238_v60, 4 }
 0x13d   :  { %3484 = vst [vmem:[#allocation15_spill] sm:$0xff] %v2408_v12  ;;  %v2438_v50 = vadd.f32 %v2268_v18, %v305_v39  ;;  %v414_v51 = vsel %vm394_vm4, %v2376_v46, 0.0  ;;  %v307_v52 = vadd.f32 %v2274_v22, %v2335_v3  ;;  %v308_v37 = vadd.f32 %v2260_v13, %v212_v40 }
 0x13e   :  { %3485 = vst [vmem:[#allocation16_spill] sm:$0xff] %v2411_v15  ;;  %v413_v44 = vadd.f32 %v412_v36, %v411_v33  ;;  %v2446_v56 = vadd.f32 %v2268_v18, %v306_v43  ;;  %v416_v31 = vsel %vm394_vm4, %v2431_v35, 0.0  ;;  %v198_v60 = vsel %vm161_vm3, %v197_v49, %v2229_v48 }
 0x13f   :  { %3486 = vst [vmem:[#allocation17_spill] sm:$0xff] %v2414_v17  ;;  %v309_v39 = vadd.f32 %v2293_v34, %v212_v40  ;;  %v418_v58 = vsel %vm394_vm4, %v2438_v50, 0.0  ;;  %v2456_v3 = vadd.f32 %v2268_v18, %v307_v52  ;;  %v310_v63 = vadd.f32 %v2263_v14, %v212_v40 }
 0x140   :  { %3487 = vst [vmem:[#allocation18_spill] sm:$0xff] %v2417_v20  ;;  %v415_v55 = vadd.f32 %v414_v51, %v413_v44  ;;  %v2460_v0 = vadd.f32 %v2268_v18, %v308_v37  ;;  %v420_v6 = vsel %vm394_vm4, %v2446_v56, 0.0  ;;  %v204_v7 = vperm.slane %v198_v60, %v2232_v54 }
 0x141   :  { %3488 = vst [vmem:[#allocation19_spill] sm:$0xff] %v2420_v21  ;;  %v311_v48 = vadd.f32 %v2299_v38, %v212_v40  ;;  %v2467_v9 = vadd.f32 %v2268_v18, %v309_v39  ;;  %v422_v11 = vsel %vm394_vm4, %v2456_v3, 0.0  ;;  %v500_v16 = vmul.f32 %v2304_v41, %v2304_v41 }
 0x142   :  { %3489 = vst [vmem:[#allocation20_spill] sm:$0xff] %v2423_v28  ;;  %v417_v57 = vadd.f32 %v416_v31, %v415_v55  ;;  %v501_v33 = vmul.f32 %v2307_v42, %v2307_v42  ;;  %v2476_v36 = vadd.f32 %v2268_v18, %v310_v63  ;;  %v424_v54 = vsel %vm394_vm4, %v2460_v0, 0.0 }
 0x143   :  { %3490 = vst [vmem:[#allocation21_spill] sm:$0xff] %v2426_v30  ;;  %v312_v44 = vadd.f32 %v2274_v22, %v212_v40  ;;  %v502_v49 = vmul.f32 %v2322_v53, %v2322_v53  ;;  %v313_v51 = vadd.f32 %v2260_v13, %v204_v7  ;;  %v2485_v52 = vadd.f32 %v2268_v18, %v311_v48 }
 0x144   :  { %v419_v59 = vadd.f32 %v418_v58, %v417_v57  ;;  %v426_v37 = vsel %vm394_vm4, %v2467_v9, 0.0  ;;  %v503_v31 = vmul.f32 %v2327_v61, %v2327_v61  ;;  %v550_v57 = vsel %vm394_vm4, %v500_v16, 0.0 }
 0x145   :  { %v551_v60 = vsel %vm394_vm4, %v501_v33, 0.0  ;;  %v213_v40 = vrot.slane %v204_v7, 4  ;;  %v314_v39 = vadd.f32 %v2293_v34, %v204_v7  ;;  %v428_v63 = vsel %vm394_vm4, %v2476_v36, 0.0 }
 0x146   :  { %v421_v8 = vadd.f32 %v420_v6, %v419_v59  ;;  %v552_v59 = vadd.f32 %v551_v60, %v550_v57  ;;  %v2497_v6 = vadd.f32 %v2268_v18, %v312_v44  ;;  %v504_v48 = vmul.f32 %v2349_v19, %v2349_v19 }
 0x147   :  { %v555_v44 = vsel %vm394_vm4, %v503_v31, 0.0  ;;  %v316_v57 = vadd.f32 %v2299_v38, %v204_v7 }
 0x148   :  { %v423_v43 = vadd.f32 %v422_v11, %v421_v8  ;;  %v553_v8 = vsel %vm394_vm4, %v502_v49, 0.0  ;;  %v315_v11 = vadd.f32 %v2263_v14, %v204_v7 }
 0x149   :  { %v554_v33 = vadd.f32 %v553_v8, %v552_v59  ;;  %v506_v59 = vmul.f32 %v2355_v23, %v2355_v23 }
 0x14a   :  { %v425_v55 = vadd.f32 %v424_v54, %v423_v43  ;;  %v2504_v43 = vadd.f32 %v2268_v18, %v313_v51  ;;  %v430_v54 = vsel %vm394_vm4, %v2485_v52, 0.0  ;;  %v432_v51 = vsel %vm394_vm4, %v2497_v6, 0.0 }
 0x14b   :  { %v556_v60 = vadd.f32 %v555_v44, %v554_v33  ;;  %v2522_v8 = vadd.f32 %v2268_v18, %v315_v11  ;;  %v317_v33 = vadd.f32 %v2274_v22, %v204_v7  ;;  %v561_v7 = vsel %vm394_vm4, %v506_v59, 0.0 }
 0x14c   :  { %v427_v58 = vadd.f32 %v426_v37, %v425_v55  ;;  %v505_v55 = vmul.f32 %v2345_v32, %v2345_v32  ;;  %v214_v37 = vsel %vm161_vm3, 0.0, %v213_v40 }
 0x14d   :  { %v318_v44 = vadd.f32 %v2260_v13, %v214_v37 }
 0x14e   :  { %v429_v16 = vadd.f32 %v428_v63, %v427_v58  ;;  %v2514_v58 = vadd.f32 %v2268_v18, %v314_v39  ;;  %v557_v63 = vsel %vm394_vm4, %v504_v48, 0.0  ;;  %v507_v39 = vmul.f32 %v2358_v26, %v2358_v26 }
 0x14f   :  { %v558_v40 = vadd.f32 %v557_v63, %v556_v60  ;;  %v2532_v48 = vadd.f32 %v2268_v18, %v316_v57  ;;  %v319_v60 = vadd.f32 %v2293_v34, %v214_v37  ;;  %v509_v57 = vmul.f32 %v2390_v62, %v2390_v62 }
 0x150   :  { %v431_v49 = vadd.f32 %v430_v54, %v429_v16  ;;  %v434_v16 = vsel %vm394_vm4, %v2504_v43, 0.0  ;;  %v559_v54 = vsel %vm394_vm4, %v505_v55, 0.0  ;;  %v436_v11 = vsel %vm394_vm4, %v2514_v58, 0.0 }
 0x151   :  { %v560_v23 = vadd.f32 %v559_v54, %v558_v40  ;;  %v438_v55 = vsel %vm394_vm4, %v2522_v8, 0.0  ;;  %v563_v40 = vsel %vm394_vm4, %v507_v39, 0.0  ;;  %v2550_v59 = vadd.f32 %v2268_v18, %v318_v44 }
 0x152   :  { %v433_v31 = vadd.f32 %v432_v51, %v431_v49  ;;  %v508_v49 = vmul.f32 %v2361_v27, %v2361_v27  ;;  %v2559_v39 = vadd.f32 %v2268_v18, %v319_v60  ;;  %v511_v44 = vmul.f32 %v2431_v35, %v2431_v35 }
 0x153   :  { %v562_v63 = vadd.f32 %v561_v7, %v560_v23  ;;  %v510_v23 = vmul.f32 %v2376_v46, %v2376_v46  ;;  %v512_v60 = vmul.f32 %v2438_v50, %v2438_v50 }
 0x154   :  { %v435_v10 = vadd.f32 %v434_v16, %v433_v31  ;;  %v2543_v31 = vadd.f32 %v2268_v18, %v317_v33  ;;  %v320_v16 = vadd.f32 %v2263_v14, %v214_v37  ;;  %v565_v33 = vsel %vm394_vm4, %v508_v49, 0.0 }
 0x155   :  { %v564_v27 = vadd.f32 %v563_v40, %v562_v63  ;;  %v567_v63 = vsel %vm394_vm4, %v509_v57, 0.0 }
 0x156   :  { %v437_v51 = vadd.f32 %v436_v11, %v435_v10  ;;  %v440_v10 = vsel %vm394_vm4, %v2532_v48, 0.0  ;;  %v321_v11 = vadd.f32 %v2299_v38, %v214_v37  ;;  %v2568_v49 = vadd.f32 %v2268_v18, %v320_v16 }
 0x157   :  { %v566_v62 = vadd.f32 %v565_v33, %v564_v27  ;;  %v444_v27 = vsel %vm394_vm4, %v2550_v59, 0.0  ;;  %v513_v16 = vmul.f32 %v2446_v56, %v2446_v56 }
 0x158   :  { %v439_v54 = vadd.f32 %v438_v55, %v437_v51  ;;  %v442_v51 = vsel %vm394_vm4, %v2543_v31, 0.0  ;;  %v322_v55 = vadd.f32 %v2274_v22, %v214_v37  ;;  %v2578_v37 = vadd.f32 %v2268_v18, %v321_v11 }
 0x159   :  { %v568_v46 = vadd.f32 %v567_v63, %v566_v62  ;;  %v446_v62 = vsel %vm394_vm4, %v2559_v39, 0.0  ;;  %v514_v11 = vmul.f32 %v2456_v3, %v2456_v3 }
 0x15a   :  { %v441_v7 = vadd.f32 %v440_v10, %v439_v54  ;;  %v569_v54 = vsel %vm394_vm4, %v510_v23, 0.0  ;;  %v323_v10 = vadd.f32 %v2260_v13, %v2247_v4  ;;  %v324_v13 = vadd.f32 %v2293_v34, %v2247_v4 }
 0x15b   :  { %v570_v57 = vadd.f32 %v569_v54, %v568_v46  ;;  %v448_v46 = vsel %vm394_vm4, %v2568_v49, 0.0  ;;  %v515_v34 = vmul.f32 %v2460_v0, %v2460_v0 }
 0x15c   :  { %v443_v40 = vadd.f32 %v442_v51, %v441_v7  ;;  %v571_v7 = vsel %vm394_vm4, %v511_v44, 0.0  ;;  %v2586_v51 = vadd.f32 %v2268_v18, %v322_v55  ;;  %v2598_v55 = vadd.f32 %v2268_v18, %v323_v10 }
 0x15d   :  { %v572_v63 = vadd.f32 %v571_v7, %v570_v57  ;;  %v575_v57 = vsel %vm394_vm4, %v513_v16, 0.0 }
 0x15e   :  { %v445_v33 = vadd.f32 %v444_v27, %v443_v40  ;;  %v573_v40 = vsel %vm394_vm4, %v512_v60, 0.0  ;;  %v325_v27 = vadd.f32 %v2263_v14, %v2247_v4  ;;  %3491 = vst [vmem:[#allocation22_spill] sm:$0xff] %v2598_v55  ;;  %v2608_v14 = vadd.f32 %v2268_v18, %v324_v13 }
 0x15f   :  { %v574_v54 = vadd.f32 %v573_v40, %v572_v63  ;;  %v452_v10 = vsel %vm394_vm4, %v2586_v51, 0.0  ;;  %v577_v63 = vsel %vm394_vm4, %v514_v11, 0.0  ;;  %v454_v13 = vsel %vm394_vm4, %v2598_v55, 0.0 }
 0x160   :  { %v447_v23 = vadd.f32 %v446_v62, %v445_v33  ;;  %v450_v33 = vsel %vm394_vm4, %v2578_v37, 0.0  ;;  %v326_v62 = vadd.f32 %v2299_v38, %v2247_v4  ;;  %3492 = vst [vmem:[#allocation23_spill] sm:$0xff] %v2608_v14  ;;  %v327_v38 = vadd.f32 %v2274_v22, %v2247_v4 }
 0x161   :  { %v576_v7 = vadd.f32 %v575_v57, %v574_v54  ;;  %v579_v54 = vsel %vm394_vm4, %v515_v34, 0.0 }
 0x162   :  { %v449_v44 = vadd.f32 %v448_v46, %v447_v23  ;;  %v516_v23 = vmul.f32 %v2467_v9, %v2467_v9  ;;  %v2616_v46 = vadd.f32 %v2268_v18, %v325_v27  ;;  %v2626_v11 = vadd.f32 %v2268_v18, %v326_v62 }
 0x163   :  { %v578_v40 = vadd.f32 %v577_v63, %v576_v7  ;;  %v456_v27 = vsel %vm394_vm4, %v2608_v14, 0.0  ;;  %v519_v62 = vmul.f32 %v2497_v6, %v2497_v6 }
 0x164   :  { %v451_v60 = vadd.f32 %v450_v33, %v449_v44  ;;  %3493 = vst [vmem:[#allocation24_spill] sm:$0xff] %v2616_v46  ;;  %v517_v44 = vmul.f32 %v2476_v36, %v2476_v36  ;;  %v581_v4 = vsel %vm394_vm4, %v516_v23, 0.0  ;;  %v458_v34 = vsel %vm394_vm4, %v2616_v46, 0.0 }
 0x165   :  { %v580_v57 = vadd.f32 %v579_v54, %v578_v40  ;;  %3494 = vst [vmem:[#allocation25_spill] sm:$0xff] %v2626_v11  ;;  %v520_v23 = vmul.f32 %v2504_v43, %v2504_v43 }
 0x166   :  { %v453_v16 = vadd.f32 %v452_v10, %v451_v60  ;;  %v518_v60 = vmul.f32 %v2485_v52, %v2485_v52  ;;  %v2634_v10 = vadd.f32 %v2268_v18, %v327_v38  ;;  %v583_v63 = vsel %vm394_vm4, %v517_v44, 0.0 }
 0x167   :  { %v582_v7 = vadd.f32 %v581_v4, %v580_v57  ;;  %v521_v57 = vmul.f32 %v2514_v58, %v2514_v58  ;;  %v587_v44 = vsel %vm394_vm4, %v519_v62, 0.0 }
 0x168   :  { %v455_v33 = vadd.f32 %v454_v13, %v453_v16  ;;  %3495 = vst [vmem:[#allocation26_spill] sm:$0xff] %v2634_v10  ;;  %v460_v13 = vsel %vm394_vm4, %v2626_v11, 0.0  ;;  %v585_v54 = vsel %vm394_vm4, %v518_v60, 0.0  ;;  %v589_v60 = vsel %vm394_vm4, %v520_v23, 0.0 }
 0x169   :  { %v584_v40 = vadd.f32 %v583_v63, %v582_v7  ;;  %v522_v7 = vmul.f32 %v2522_v8, %v2522_v8  ;;  %v591_v62 = vsel %vm394_vm4, %v521_v57, 0.0 }
 0x16a   :  { %v457_v22 = vadd.f32 %v456_v27, %v455_v33  ;;  %v462_v33 = vsel %vm394_vm4, %v2634_v10, 0.0 }
 0x16b   :  { %v586_v38 = vadd.f32 %v585_v54, %v584_v40  ;;  %v523_v40 = vmul.f32 %v2532_v48, %v2532_v48  ;;  %v593_v23 = vsel %vm394_vm4, %v522_v7, 0.0 }
 0x16c   :  { %v459_v16 = vadd.f32 %v458_v34, %v457_v22  ;;  %v464_v22 = vsel %vm394_vm4, %v2279_v24, 0.0 }
 0x16d   :  { %v588_v4 = vadd.f32 %v587_v44, %v586_v38  ;;  %v524_v38 = vmul.f32 %v2543_v31, %v2543_v31  ;;  %v595_v57 = vsel %vm394_vm4, %v523_v40, 0.0 }
 0x16e   :  { %v461_v18 = vadd.f32 %v460_v13, %v459_v16  ;;  %v466_v16 = vsel %vm394_vm4, %v2311_v45, 0.0 }
 0x16f   :  { %v590_v63 = vadd.f32 %v589_v60, %v588_v4  ;;  %v525_v4 = vmul.f32 %v2550_v59, %v2550_v59  ;;  %v597_v7 = vsel %vm394_vm4, %v524_v38, 0.0 }
 0x170   :  { %v463_v27 = vadd.f32 %v462_v33, %v461_v18  ;;  %v468_v18 = vsel %vm394_vm4, %v2282_v25, 0.0 }
 0x171   :  { %v592_v54 = vadd.f32 %v591_v62, %v590_v63  ;;  %v526_v63 = vmul.f32 %v2559_v39, %v2559_v39  ;;  %v599_v40 = vsel %vm394_vm4, %v525_v4, 0.0  ;;  %v529_v4 = vmul.f32 %v2586_v51, %v2586_v51 }
 0x172   :  { %v465_v34 = vadd.f32 %v464_v22, %v463_v27  ;;  %v470_v27 = vsel %vm394_vm4, %v2314_v47, 0.0 }
 0x173   :  { %v594_v44 = vadd.f32 %v593_v23, %v592_v54  ;;  %v527_v54 = vmul.f32 %v2568_v49, %v2568_v49  ;;  %v601_v38 = vsel %vm394_vm4, %v526_v63, 0.0  ;;  %v480_v63 = vsel %vm394_vm4, %v2408_v12, 0.0 }
 0x174   :  { %v467_v13 = vadd.f32 %v466_v16, %v465_v34  ;;  %v472_v34 = vsel %vm394_vm4, %v2287_v29, 0.0 }
 0x175   :  { %v596_v60 = vadd.f32 %v595_v57, %v594_v44  ;;  %v528_v44 = vmul.f32 %v2578_v37, %v2578_v37  ;;  %v2093_v57 = vld [vmem:[%s3439_s3] sm:$0xff] }
 0x176   :  { %v469_v33 = vadd.f32 %v468_v18, %v467_v13  ;;  %v474_v13 = vsel %vm394_vm4, %v2394_v1, 0.0  ;;  %1506 = vmatpush.bf16.msra.mxu2 %v2093_v57  ;;  %v532_v57 = vmul.f32 %v2616_v46, %v2616_v46 }
 0x177   :  { %v598_v62 = vadd.f32 %v597_v7, %v596_v60  ;;  %v478_v60 = vsel %vm394_vm4, %v2400_v5, 0.0 }
 0x178   :  { %v471_v22 = vadd.f32 %v470_v27, %v469_v33  ;;  %v476_v33 = vsel %vm394_vm4, %v2397_v2, 0.0 }
 0x179   :  { %v600_v23 = vadd.f32 %v599_v40, %v598_v62  ;;  %v530_v62 = vmul.f32 %v2598_v55, %v2598_v55 }
 0x17a   :  { %v473_v16 = vadd.f32 %v472_v34, %v471_v22  ;;  %v603_v34 = vsel %vm394_vm4, %v527_v54, 0.0  ;;  %v607_v54 = vsel %vm394_vm4, %v529_v4, 0.0  ;;  %v534_v4 = vmul.f32 %v2634_v10, %v2634_v10 }
 0x17b   :  { %v602_v22 = vadd.f32 %v601_v38, %v600_v23  ;;  %v482_v23 = vsel %vm394_vm4, %v2411_v15, 0.0 }
 0x17c   :  { %v475_v18 = vadd.f32 %v474_v13, %v473_v16  ;;  %v605_v13 = vsel %vm394_vm4, %v528_v44, 0.0  ;;  %v484_v44 = vsel %vm394_vm4, %v2414_v17, 0.0 }
 0x17d   :  { %v604_v16 = vadd.f32 %v603_v34, %v602_v22  ;;  %v609_v22 = vsel %vm394_vm4, %v530_v62, 0.0  ;;  %v533_v34 = vmul.f32 %v2626_v11, %v2626_v11  ;;  %v535_v62 = vmul.f32 %v2279_v24, %v2279_v24 }
 0x17e   :  { %v477_v27 = vadd.f32 %v476_v33, %v475_v18  ;;  %v531_v33 = vmul.f32 %v2608_v14, %v2608_v14 }
 0x17f   :  { %v606_v18 = vadd.f32 %v605_v13, %v604_v16  ;;  %v613_v13 = vsel %vm394_vm4, %v532_v57, 0.0  ;;  %v537_v57 = vmul.f32 %v2282_v25, %v2282_v25 }
 0x180   :  { %v479_v7 = vadd.f32 %v478_v60, %v477_v27 }
 0x181   :  { %v608_v27 = vadd.f32 %v607_v54, %v606_v18  ;;  %v486_v18 = vsel %vm394_vm4, %v2417_v20, 0.0 }
 0x182   :  { %v481_v40 = vadd.f32 %v480_v63, %v479_v7  ;;  %v611_v7 = vsel %vm394_vm4, %v531_v33, 0.0  ;;  %v617_v33 = vsel %vm394_vm4, %v534_v4, 0.0 }
 0x183   :  { %v610_v60 = vadd.f32 %v609_v22, %v608_v27 }
 0x184   :  { %v483_v38 = vadd.f32 %v482_v23, %v481_v40  ;;  %v615_v23 = vsel %vm394_vm4, %v533_v34, 0.0  ;;  %v538_v34 = vmul.f32 %v2314_v47, %v2314_v47 }
 0x185   :  { %v612_v63 = vadd.f32 %v611_v7, %v610_v60  ;;  %v488_v60 = vsel %vm394_vm4, %v2420_v21, 0.0 }
 0x186   :  { %v485_v16 = vadd.f32 %v484_v44, %v483_v38  ;;  %v536_v38 = vmul.f32 %v2311_v45, %v2311_v45  ;;  %v619_v44 = vsel %vm394_vm4, %v535_v62, 0.0  ;;  %v540_v62 = vmul.f32 %v2394_v1, %v2394_v1 }
 0x187   :  { %v614_v40 = vadd.f32 %v613_v13, %v612_v63  ;;  %v539_v13 = vmul.f32 %v2287_v29, %v2287_v29 }
 0x188   :  { %v487_v54 = vadd.f32 %v486_v18, %v485_v16  ;;  %v621_v16 = vsel %vm394_vm4, %v536_v38, 0.0  ;;  %v490_v18 = vsel %vm394_vm4, %v2423_v28, 0.0  ;;  %v492_v38 = vsel %vm394_vm4, %v2426_v30, 0.0 }
 0x189   :  { %v616_v27 = vadd.f32 %v615_v23, %v614_v40  ;;  %v623_v40 = vsel %vm394_vm4, %v537_v57, 0.0 }
 0x18a   :  { %v489_v7 = vadd.f32 %v488_v60, %v487_v54  ;;  %v625_v54 = vsel %vm394_vm4, %v538_v34, 0.0  ;;  %v541_v60 = vmul.f32 %v2397_v2, %v2397_v2  ;;  %v543_v34 = vmul.f32 %v2408_v12, %v2408_v12 }
 0x18b   :  { %v618_v22 = vadd.f32 %v617_v33, %v616_v27 }
 0x18c   :  { %v491_v23 = vadd.f32 %v490_v18, %v489_v7  ;;  %v542_v7 = vmul.f32 %v2400_v5, %v2400_v5  ;;  %v544_v18 = vmul.f32 %v2411_v15, %v2411_v15 }
 0x18d   :  { %v620_v63 = vadd.f32 %v619_v44, %v618_v22  ;;  %v627_v22 = vsel %vm394_vm4, %v539_v13, 0.0 }
 0x18e   :  { %v493_v57 = vadd.f32 %v492_v38, %v491_v23  ;;  %v546_v38 = vmul.f32 %v2417_v20, %v2417_v20 }
 0x18f   :  { %v622_v4 = vadd.f32 %v621_v16, %v620_v63  ;;  %v629_v63 = vsel %vm394_vm4, %v540_v62, 0.0 }
 0x190   :  { %v494_v13 = vrot.slane %v493_v57, 4 }
 0x191   :  { %v624_v27 = vadd.f32 %v623_v40, %v622_v4  ;;  %v631_v4 = vsel %vm394_vm4, %v541_v60, 0.0  ;;  %v637_v60 = vsel %vm394_vm4, %v544_v18, 0.0 }
 0x192   :  { %v495_v62 = vadd.f32 %v494_v13, %v493_v57  ;;  %v549_v13 = vmul.f32 %v2426_v30, %v2426_v30 }
 0x193   :  { %v626_v33 = vadd.f32 %v625_v54, %v624_v27  ;;  %v633_v27 = vsel %vm394_vm4, %v542_v7, 0.0  ;;  %v545_v54 = vmul.f32 %v2414_v17, %v2414_v17 }
 0x194   :  { %v496_v7 = vrot.slane %v495_v62, 2 }
 0x195   :  { %v628_v44 = vadd.f32 %v627_v22, %v626_v33  ;;  %v635_v33 = vsel %vm394_vm4, %v543_v34, 0.0  ;;  %v641_v34 = vsel %vm394_vm4, %v546_v38, 0.0 }
 0x196   :  { %v497_v18 = vadd.f32 %v496_v7, %v495_v62 }
 0x197   :  { %v630_v16 = vadd.f32 %v629_v63, %v628_v44  ;;  %v547_v63 = vmul.f32 %v2420_v21, %v2420_v21 }
 0x199   :  { %v632_v40 = vadd.f32 %v631_v4, %v630_v16  ;;  %v639_v16 = vsel %vm394_vm4, %v545_v54, 0.0  ;;  %v647_v54 = vsel %vm394_vm4, %v549_v13, 0.0 }
 0x19b   :  { %v634_v23 = vadd.f32 %v633_v27, %v632_v40  ;;  %v548_v40 = vmul.f32 %v2423_v28, %v2423_v28  ;;  %v643_v27 = vsel %vm394_vm4, %v547_v63, 0.0 }
 0x19d   :  { %v636_v22 = vadd.f32 %v635_v33, %v634_v23  ;;  %v645_v33 = vsel %vm394_vm4, %v548_v40, 0.0 }
 0x19f   :  { %v638_v44 = vadd.f32 %v637_v60, %v636_v22  ;;  %v498_v60 = vrot.slane %v497_v18, 1 }
 0x1a1   :  { %v640_v4 = vadd.f32 %v639_v16, %v638_v44  ;;  %v499_v21 = vadd.f32 %v498_v60, %v497_v18 }
 0x1a3   :  { %v642_v57 = vadd.f32 %v641_v34, %v640_v4  ;;  %v2770_v38 = vmul.f32 0.005, %v499_v21 }
 0x1a5   :  { %v644_v23 = vadd.f32 %v643_v27, %v642_v57  ;;  %v657_v62 = vmul.f32 %v2770_v38, %v2770_v38  ;;  %v660_v21 = vsub.f32 %v2304_v41, %v2770_v38  ;;  %v667_v41 = vsub.f32 %v2358_v26, %v2770_v38 }
 0x1a6   :  { %v674_v26 = vsub.f32 %v2456_v3, %v2770_v38 }
 0x1a7   :  { %v646_v22 = vadd.f32 %v645_v33, %v644_v23  ;;  %v664_v23 = vsub.f32 %v2349_v19, %v2770_v38  ;;  %v671_v19 = vsub.f32 %v2431_v35, %v2770_v38 }
 0x1a9   :  { %v648_v44 = vadd.f32 %v647_v54, %v646_v22  ;;  %v665_v22 = vsub.f32 %v2345_v32, %v2770_v38  ;;  %v3496_v54 = vld [vmem:[#allocation8_spill] sm:$0xff]  ;;  %v672_v32 = vsub.f32 %v2438_v50, %v2770_v38 }
 0x1aa   :  { %v666_v60 = vsub.f32 %v3496_v54, %v2770_v38 }
 0x1ab   :  { %v649_v16 = vrot.slane %v648_v44, 4 }
 0x1ad   :  { %v650_v28 = vadd.f32 %v649_v16, %v648_v44 }
 0x1af   :  { %v651_v20 = vrot.slane %v650_v28, 2 }
 0x1b1   :  { %v652_v4 = vadd.f32 %v651_v20, %v650_v28  ;;  %v661_v20 = vsub.f32 %v2307_v42, %v2770_v38  ;;  %v662_v28 = vsub.f32 %v2322_v53, %v2770_v38  ;;  %v3497_v42 = vld [vmem:[#allocation9_spill] sm:$0xff]  ;;  %v3498_v53 = vld [vmem:[#allocation11_spill] sm:$0xff] }
 0x1b2   :  { %v668_v44 = vsub.f32 %v3497_v42, %v2770_v38  ;;  %v669_v16 = vsub.f32 %v3498_v53, %v2770_v38 }
 0x1b3   :  { %v653_v34 = vrot.slane %v652_v4, 1 }
 0x1b5   :  { %v654_v30 = vadd.f32 %v653_v34, %v652_v4 }
 0x1b7   :  { %v656_v63 = vmul.f32 0.005, %v654_v30  ;;  %v663_v30 = vsub.f32 %v2327_v61, %v2770_v38  ;;  %v3499_v61 = vld [vmem:[#allocation10_spill] sm:$0xff] }
 0x1b8   :  { %v670_v4 = vsub.f32 %v3499_v61, %v2770_v38 }
 0x1b9   :  { %v658_v7 = vsub.f32 %v656_v63, %v657_v62  ;;  %v673_v62 = vsub.f32 %v2446_v56, %v2770_v38  ;;  %v675_v63 = vsub.f32 %v2460_v0, %v2770_v38 }
 0x1bb   :  { %v659_v40 = vmax.f32 %v658_v7, 0.0 }
 0x1bd   :  { %v710_v57 = vadd.f32 1e-05, %v659_v40  ;;  %v3500_v40 = vld [vmem:[#allocation2_spill] sm:$0xff] }
 0x1be   :  { %v2836_v18 = vperm.slane %v3500_v40, 2 }
 0x1bf   :  { %2107 = vrsqrt.f32 %v710_v57  ;;  %vm717_vm6 = vweird.f32 %v710_v57 }
 0x1c0   :  { %3501 = vst [vmem:[#allocation8_spill] sm:$0xff] %v2836_v18 }
 0x1c5   :  { %v2108_v13 = vpop.eup %2107 }
 0x1c6   :  { %v712_v27 = vmul.f32 %v2108_v13, %v710_v57  ;;  %vm718_vm5 = vweird.f32 %v2108_v13 }
 0x1c7   :  { %vm719_vm7 = vmor %vm717_vm6, %vm718_vm5  ;;  %vm1692_vm5 = vcmask 64512  }
 0x1c8   :  { %v713_v33 = vmul.f32 %v2108_v13, %v712_v27  ;;  %v2809_v27 = vperm.slane %v3500_v40, 1 }
 0x1ca   :  { %v714_v34 = vmul.f32 0.5, %v713_v33 }
 0x1cc   :  { %v715_v7 = vsub.f32 1.5, %v714_v34 }
 0x1ce   :  { %v716_v33 = vmul.f32 %v2108_v13, %v715_v7 }
 0x1d0   :  { %v2833_v57 = vsel %vm719_vm7, %v2108_v13, %v716_v33 }
 0x1d1   :  { %v721_v54 = vmul.f32 %v2833_v57, %v660_v21  ;;  %v722_v61 = vmul.f32 %v2833_v57, %v661_v20  ;;  %v723_v34 = vmul.f32 %v2833_v57, %v662_v28  ;;  %v724_v0 = vmul.f32 %v2833_v57, %v663_v30 }
 0x1d2   :  { %v725_v13 = vmul.f32 %v2833_v57, %v664_v23  ;;  %v726_v53 = vmul.f32 %v2833_v57, %v665_v22  ;;  %v727_v21 = vmul.f32 %v2833_v57, %v666_v60  ;;  %v728_v20 = vmul.f32 %v2833_v57, %v667_v41 }
 0x1d3   :  { %v729_v28 = vmul.f32 %v2833_v57, %v668_v44  ;;  %v730_v30 = vmul.f32 %v2833_v57, %v669_v16  ;;  %v731_v23 = vmul.f32 %v2833_v57, %v670_v4  ;;  %v732_v40 = vmul.f32 %v2833_v57, %v671_v19 }
 0x1d4   :  { %v733_v7 = vmul.f32 %v2833_v57, %v672_v32  ;;  %v772_v33 = vmul.f32 %v2809_v27, %v721_v54  ;;  %v773_v42 = vmul.f32 %v2809_v27, %v722_v61  ;;  %v774_v22 = vmul.f32 %v2809_v27, %v723_v34 }
 0x1d5   :  { %v775_v60 = vmul.f32 %v2809_v27, %v724_v0  ;;  %v734_v41 = vmul.f32 %v2833_v57, %v673_v62  ;;  %v735_v44 = vmul.f32 %v2833_v57, %v674_v26  ;;  %v736_v16 = vmul.f32 %v2833_v57, %v675_v63 }
 0x1d6   :  { %v776_v4 = vmul.f32 %v2809_v27, %v725_v13  ;;  %v777_v19 = vmul.f32 %v2809_v27, %v726_v53  ;;  %v778_v32 = vmul.f32 %v2809_v27, %v727_v21  ;;  %v779_v54 = vmul.f32 %v2809_v27, %v728_v20 }
 0x1d7   :  { %v780_v61 = vmul.f32 %v2809_v27, %v729_v28  ;;  %v781_v34 = vmul.f32 %v2809_v27, %v730_v30  ;;  %v782_v0 = vmul.f32 %v2809_v27, %v731_v23  ;;  %v783_v62 = vmul.f32 %v2809_v27, %v732_v40 }
 0x1d8   :  { %v784_v26 = vmul.f32 %v2809_v27, %v733_v7  ;;  %v823_v63 = vadd.f32 %v2836_v18, %v772_v33  ;;  %v824_v13 = vadd.f32 %v2836_v18, %v773_v42  ;;  %v825_v53 = vadd.f32 %v2836_v18, %v774_v22 }
 0x1d9   :  { %v826_v21 = vadd.f32 %v2836_v18, %v775_v60  ;;  %v785_v20 = vmul.f32 %v2809_v27, %v734_v41  ;;  %v786_v28 = vmul.f32 %v2809_v27, %v735_v44  ;;  %v787_v30 = vmul.f32 %v2809_v27, %v736_v16 }
 0x1da   :  { %v827_v23 = vadd.f32 %v2836_v18, %v776_v4  ;;  %v828_v40 = vadd.f32 %v2836_v18, %v777_v19  ;;  %v829_v7 = vadd.f32 %v2836_v18, %v778_v32  ;;  %v830_v33 = vadd.f32 %v2836_v18, %v779_v54 }
 0x1db   :  { %v2889_v42 = vadd.f32 %v2836_v18, %v780_v61  ;;  %v2892_v22 = vadd.f32 %v2836_v18, %v781_v34  ;;  %v2895_v60 = vadd.f32 %v2836_v18, %v782_v0  ;;  %v2898_v41 = vadd.f32 %v2836_v18, %v783_v62 }
 0x1dc   :  { %v2901_v44 = vadd.f32 %v2836_v18, %v784_v26  ;;  %v873_v16 = vmax.f32 %v823_v63, 0.0  ;;  %v874_v4 = vmax.f32 %v824_v13, 0.0  ;;  %v875_v19 = vmax.f32 %v825_v53, 0.0 }
 0x1dd   :  { %v876_v32 = vmax.f32 %v826_v21, 0.0  ;;  %v2904_v54 = vadd.f32 %v2836_v18, %v785_v20  ;;  %v2907_v61 = vadd.f32 %v2836_v18, %v786_v28  ;;  %v2910_v34 = vadd.f32 %v2836_v18, %v787_v30 }
 0x1de   :  { %v877_v0 = vmax.f32 %v827_v23, 0.0  ;;  %v878_v3 = vmax.f32 %v828_v40, 0.0  ;;  %v879_v62 = vmax.f32 %v829_v7, 0.0  ;;  %v880_v56 = vmax.f32 %v830_v33, 0.0 }
 0x1df   :  { %v881_v26 = vmax.f32 %v2889_v42, 0.0  ;;  %v882_v63 = vmax.f32 %v2892_v22, 0.0  ;;  %v883_v13 = vmax.f32 %v2895_v60, 0.0  ;;  %v884_v53 = vmax.f32 %v2898_v41, 0.0 }
 0x1e0   :  { %v923_v20 = vsel %vm394_vm4, %v873_v16, -inf  ;;  %v930_v28 = vsel %vm394_vm4, %v874_v4, -inf  ;;  %v937_v30 = vsel %vm394_vm4, %v875_v19, -inf  ;;  %v944_v23 = vsel %vm394_vm4, %v876_v32, -inf }
 0x1e1   :  { %v924_v40 = vrot.slane %v923_v20, 4  ;;  %v931_v7 = vrot.slane %v930_v28, 4  ;;  %v938_v33 = vrot.slane %v937_v30, 4  ;;  %v945_v42 = vrot.slane %v944_v23, 4 }
 0x1e2   :  { %v951_v22 = vsel %vm394_vm4, %v877_v0, -inf  ;;  %v958_v60 = vsel %vm394_vm4, %v878_v3, -inf  ;;  %v965_v41 = vsel %vm394_vm4, %v879_v62, -inf  ;;  %v972_v50 = vsel %vm394_vm4, %v880_v56, -inf }
 0x1e3   :  { %v925_v35 = vmax.f32 %v923_v20, %v924_v40  ;;  %v932_v16 = vmax.f32 %v930_v28, %v931_v7  ;;  %v939_v21 = vmax.f32 %v937_v30, %v938_v33  ;;  %v946_v4 = vmax.f32 %v944_v23, %v945_v42 }
 0x1e4   :  { %v952_v1 = vrot.slane %v951_v22, 4  ;;  %v959_v19 = vrot.slane %v958_v60, 4  ;;  %v966_v17 = vrot.slane %v965_v41, 4  ;;  %v973_v32 = vrot.slane %v972_v50, 4 }
 0x1e5   :  { %v926_v15 = vrot.slane %v925_v35, 2  ;;  %v933_v12 = vrot.slane %v932_v16, 2  ;;  %v940_v5 = vrot.slane %v939_v21, 2  ;;  %v947_v29 = vrot.slane %v946_v4, 2 }
 0x1e6   :  { %v953_v47 = vmax.f32 %v951_v22, %v952_v1  ;;  %v960_v0 = vmax.f32 %v958_v60, %v959_v19  ;;  %v967_v25 = vmax.f32 %v965_v41, %v966_v17  ;;  %v974_v3 = vmax.f32 %v972_v50, %v973_v32 }
 0x1e7   :  { %v927_v45 = vmax.f32 %v925_v35, %v926_v15  ;;  %v934_v62 = vmax.f32 %v932_v16, %v933_v12  ;;  %v941_v24 = vmax.f32 %v939_v21, %v940_v5  ;;  %v948_v56 = vmax.f32 %v946_v4, %v947_v29 }
 0x1e8   :  { %v954_v20 = vrot.slane %v953_v47, 2  ;;  %v961_v28 = vrot.slane %v960_v0, 2  ;;  %v968_v30 = vrot.slane %v967_v25, 2  ;;  %v975_v23 = vrot.slane %v974_v3, 2 }
 0x1e9   :  { %v928_v40 = vrot.slane %v927_v45, 1  ;;  %v935_v7 = vrot.slane %v934_v62, 1  ;;  %v942_v33 = vrot.slane %v941_v24, 1  ;;  %v949_v42 = vrot.slane %v948_v56, 1 }
 0x1ea   :  { %v955_v10 = vmax.f32 %v953_v47, %v954_v20  ;;  %v962_v11 = vmax.f32 %v960_v0, %v961_v28  ;;  %v969_v46 = vmax.f32 %v967_v25, %v968_v30  ;;  %v2925_v2 = vmax.f32 %v974_v3, %v975_v23 }
 0x1eb   :  { %v886_v1 = vmax.f32 %v2904_v54, 0.0  ;;  %v887_v15 = vmax.f32 %v2907_v61, 0.0  ;;  %v888_v5 = vmax.f32 %v2910_v34, 0.0  ;;  %v2930_v29 = vmax.f32 %v927_v45, %v928_v40 }
 0x1ec   :  { %v2932_v12 = vmax.f32 %v934_v62, %v935_v7  ;;  %v2934_v17 = vmax.f32 %v941_v24, %v942_v33  ;;  %v2936_v35 = vmax.f32 %v948_v56, %v949_v42  ;;  %v956_v50 = vrot.slane %v955_v10, 1 }
 0x1ed   :  { %v979_v47 = vsel %vm394_vm4, %v881_v26, -inf  ;;  %v986_v25 = vsel %vm394_vm4, %v882_v63, -inf  ;;  %v993_v21 = vsel %vm394_vm4, %v883_v13, -inf  ;;  %v1000_v54 = vsel %vm394_vm4, %v884_v53, -inf }
 0x1ee   :  { %v2942_v61 = vmax.f32 %v955_v10, %v956_v50  ;;  %v963_v34 = vrot.slane %v962_v11, 1  ;;  %v970_v45 = vrot.slane %v969_v46, 1  ;;  %v977_v22 = vrot.slane %v2925_v2, 1 }
 0x1ef   :  { %v980_v60 = vrot.slane %v979_v47, 4  ;;  %v987_v24 = vrot.slane %v986_v25, 4  ;;  %v994_v41 = vrot.slane %v993_v21, 4  ;;  %v1001_v16 = vrot.slane %v1000_v54, 4 }
 0x1f0   :  { %v3502_v4 = vmax.f32 %v2901_v44, 0.0  ;;  %v1014_v63 = vsel %vm394_vm4, %v886_v1, -inf  ;;  %v1021_v13 = vsel %vm394_vm4, %v887_v15, -inf  ;;  %v1028_v53 = vsel %vm394_vm4, %v888_v5, -inf }
 0x1f1   :  { %v981_v10 = vmax.f32 %v979_v47, %v980_v60  ;;  %v988_v19 = vmax.f32 %v986_v25, %v987_v24  ;;  %v995_v32 = vmax.f32 %v993_v21, %v994_v41  ;;  %v1002_v0 = vmax.f32 %v1000_v54, %v1001_v16 }
 0x1f2   :  { %v1007_v26 = vsel %vm394_vm4, %v3502_v4, -inf  ;;  %v1015_v62 = vrot.slane %v1014_v63, 4  ;;  %v1022_v56 = vrot.slane %v1021_v13, 4  ;;  %v1029_v20 = vrot.slane %v1028_v53, 4 }
 0x1f3   :  { %v1008_v3 = vrot.slane %v1007_v26, 4  ;;  %v982_v28 = vrot.slane %v981_v10, 2  ;;  %v989_v30 = vrot.slane %v988_v19, 2  ;;  %v996_v23 = vrot.slane %v995_v32, 2 }
 0x1f4   :  { %v1003_v44 = vrot.slane %v1002_v0, 2  ;;  %v1016_v7 = vmax.f32 %v1014_v63, %v1015_v62  ;;  %v1023_v33 = vmax.f32 %v1021_v13, %v1022_v56  ;;  %v1030_v42 = vmax.f32 %v1028_v53, %v1029_v20 }
 0x1f5   :  { %v1009_v40 = vmax.f32 %v1007_v26, %v1008_v3  ;;  %v983_v1 = vmax.f32 %v981_v10, %v982_v28  ;;  %v990_v15 = vmax.f32 %v988_v19, %v989_v30  ;;  %v997_v50 = vmax.f32 %v995_v32, %v996_v23 }
 0x1f6   :  { %v1004_v5 = vmax.f32 %v1002_v0, %v1003_v44  ;;  %v1017_v25 = vrot.slane %v1016_v7, 2  ;;  %v1024_v21 = vrot.slane %v1023_v33, 2  ;;  %v1031_v54 = vrot.slane %v1030_v42, 2 }
 0x1f7   :  { %v1010_v47 = vrot.slane %v1009_v40, 2  ;;  %v984_v60 = vrot.slane %v983_v1, 1  ;;  %v991_v24 = vrot.slane %v990_v15, 1  ;;  %v998_v41 = vrot.slane %v997_v50, 1 }
 0x1f8   :  { %v1005_v16 = vrot.slane %v1004_v5, 1  ;;  %v1018_v18 = vmax.f32 %v1016_v7, %v1017_v25  ;;  %v1025_v14 = vmax.f32 %v1023_v33, %v1024_v21  ;;  %v1032_v55 = vmax.f32 %v1030_v42, %v1031_v54 }
 0x1f9   :  { %v1011_v4 = vmax.f32 %v1009_v40, %v1010_v47  ;;  %v964_v26 = vmax.f32 %v962_v11, %v963_v34  ;;  %v971_v63 = vmax.f32 %v969_v46, %v970_v45  ;;  %v985_v13 = vmax.f32 %v983_v1, %v984_v60 }
 0x1fa   :  { %v992_v53 = vmax.f32 %v990_v15, %v991_v24  ;;  %v1019_v19 = vrot.slane %v1018_v18, 1  ;;  %v1026_v32 = vrot.slane %v1025_v14, 1  ;;  %v1033_v0 = vrot.slane %v1032_v55, 1 }
 0x1fb   :  { %v1012_v10 = vrot.slane %v1011_v4, 1  ;;  %v978_v3 = vmax.f32 %v2925_v2, %v977_v22  ;;  %v999_v62 = vmax.f32 %v997_v50, %v998_v41  ;;  %v1006_v56 = vmax.f32 %v1004_v5, %v1005_v16 }
 0x1fc   :  { %v1273_v20 = vpack.c.bf16 %v2930_v29, %v2930_v29  ;;  %v1020_v30 = vmax.f32 %v1018_v18, %v1019_v19  ;;  %v1027_v23 = vmax.f32 %v1025_v14, %v1026_v32  ;;  %v1034_v44 = vmax.f32 %v1032_v55, %v1033_v0 }
 0x1fd   :  { %v1013_v28 = vmax.f32 %v1011_v4, %v1012_v10  ;;  %v1274_v46 = vpack.c.bf16 %v2932_v12, %v2932_v12  ;;  %v1275_v11 = vpack.c.bf16 %v2934_v17, %v2934_v17  ;;  %v1276_v34 = vpack.c.bf16 %v2936_v35, %v2936_v35 }
 0x1fe   :  { %v1277_v2 = vpack.c.bf16 %v2942_v61, %v2942_v61  ;;  %v1278_v45 = vpack.c.bf16 %v964_v26, %v964_v26  ;;  %v1279_v22 = vpack.c.bf16 %v971_v63, %v971_v63  ;;  %v1281_v40 = vpack.c.bf16 %v985_v13, %v985_v13 }
 0x1ff   :  { %v1282_v29 = vpack.c.bf16 %v992_v53, %v992_v53  ;;  %v1280_v7 = vpack.c.bf16 %v978_v3, %v978_v3  ;;  %v1283_v18 = vpack.c.bf16 %v999_v62, %v999_v62  ;;  %v1284_v14 = vpack.c.bf16 %v1006_v56, %v1006_v56 }
 0x200   :  { %v1285_v55 = vpack.c.bf16 %v1013_v28, %v1013_v28  ;;  %v1286_v33 = vpack.c.bf16 %v1020_v30, %v1020_v30  ;;  %v1287_v42 = vpack.c.bf16 %v1027_v23, %v1027_v23  ;;  %v1288_v12 = vpack.c.bf16 %v1034_v44, %v1034_v44 }
 0x201   :  { %v1376_v1 = vunpack.c.l.b16 %v1273_v20  ;;  %v1377_v15 = vunpack.c.l.b16 %v1274_v46  ;;  %v1378_v17 = vunpack.c.l.b16 %v1275_v11  ;;  %v1379_v50 = vunpack.c.l.b16 %v1276_v34 }
 0x202   :  { %v1380_v5 = vunpack.c.l.b16 %v1277_v2  ;;  %v1381_v35 = vunpack.c.l.b16 %v1278_v45  ;;  %v1382_v47 = vunpack.c.l.b16 %v1279_v22  ;;  %v1384_v25 = vunpack.c.l.b16 %v1281_v40 }
 0x203   :  { %v1385_v61 = vunpack.c.l.b16 %v1282_v29  ;;  %v1383_v21 = vunpack.c.l.b16 %v1280_v7  ;;  %v1386_v54 = vunpack.c.l.b16 %v1283_v18  ;;  %v1387_v60 = vunpack.c.l.b16 %v1284_v14 }
 0x204   :  { %v1388_v24 = vunpack.c.l.b16 %v1285_v55  ;;  %v1389_v41 = vunpack.c.l.b16 %v1286_v33  ;;  %v1390_v16 = vunpack.c.l.b16 %v1287_v42  ;;  %v1391_v4 = vunpack.c.l.b16 %v1288_v12 }
 0x205   :  { %v1427_v26 = vsel %vm1426_vm8, %v1377_v15, %v1376_v1  ;;  %v1440_v13 = vsel %vm1426_vm8, %v1385_v61, %v1384_v25  ;;  %v3503_v0 = vsub.f32 %v2467_v9, %v2770_v38  ;;  %v3504_v62 = vsub.f32 %v2476_v36, %v2770_v38 }
 0x206   :  { %v1429_v63 = vsel %vm1428_vm9, %v1378_v17, %v1427_v26  ;;  %v1441_v10 = vsel %vm1428_vm9, %v1386_v54, %v1440_v13  ;;  %v3505_v30 = vsub.f32 %v2485_v52, %v2770_v38  ;;  %v3506_v44 = vsub.f32 %v2497_v6, %v2770_v38 }
 0x207   :  { %v1431_v53 = vsel %vm1430_vm10, %v1379_v50, %v1429_v63  ;;  %v1442_v32 = vsel %vm1430_vm10, %v1387_v60, %v1441_v10  ;;  %v737_v3 = vmul.f32 %v2833_v57, %v3503_v0  ;;  %v738_v56 = vmul.f32 %v2833_v57, %v3504_v62  ;;  %v3521_v63 = vld [vmem:[#allocation8_spill] sm:$0xff] }
 0x208   :  { %v1433_v19 = vsel %vm1432_vm11, %v1380_v5, %v1431_v53  ;;  %v1443_v28 = vsel %vm1432_vm11, %v1388_v24, %v1442_v32  ;;  %v739_v23 = vmul.f32 %v2833_v57, %v3505_v30  ;;  %v740_v9 = vmul.f32 %v2833_v57, %v3506_v44  ;;  %v3517_v5 = vld [vmem:[#allocation22_spill] sm:$0xff] }
 0x209   :  { %v1435_v20 = vsel %vm1434_vm12, %v1381_v35, %v1433_v19  ;;  %v1444_v36 = vsel %vm1434_vm12, %v1389_v41, %v1443_v28  ;;  %v3507_v11 = vsub.f32 %v2504_v43, %v2770_v38  ;;  %v3508_v2 = vsub.f32 %v2514_v58, %v2770_v38 }
 0x20a   :  { %v1437_v46 = vsel %vm1436_vm13, %v1382_v47, %v1435_v20  ;;  %v1445_v6 = vsel %vm1436_vm13, %v1390_v16, %v1444_v36  ;;  %v3509_v22 = vsub.f32 %v2522_v8, %v2770_v38  ;;  %v3510_v29 = vsub.f32 %v2532_v48, %v2770_v38  ;;  %v3519_v47 = vld [vmem:[#allocation23_spill] sm:$0xff] }
 0x20b   :  { %v741_v34 = vmul.f32 %v2833_v57, %v3507_v11  ;;  %v742_v52 = vmul.f32 %v2833_v57, %v3508_v2  ;;  %v1439_v45 = vsel %vm1438_vm14, %v1383_v21, %v1437_v46  ;;  %v1446_v7 = vsel %vm1438_vm14, %v1391_v4, %v1445_v6 }
 0x20c   :  { %v743_v40 = vmul.f32 %v2833_v57, %v3509_v22  ;;  %v744_v43 = vmul.f32 %v2833_v57, %v3510_v29  ;;  %v3511_v58 = vsub.f32 %v2543_v31, %v2770_v38  ;;  %v3512_v14 = vsub.f32 %v2550_v59, %v2770_v38 }
 0x20d   :  { %v3513_v8 = vsub.f32 %v2559_v39, %v2770_v38  ;;  %v1476_v48 = vpack.c.b16 %v1446_v7, %v1439_v45  ;;  %v3514_v42 = vsub.f32 %v2568_v49, %v2770_v38  ;;  %v3515_v31 = vsub.f32 %v2578_v37, %v2770_v38 }
 0x20e   :  { %v745_v18 = vmul.f32 %v2833_v57, %v3511_v58  ;;  %v746_v55 = vmul.f32 %v2833_v57, %v3512_v14  ;;  %v788_v59 = vmul.f32 %v2809_v27, %v737_v3  ;;  %v3516_v15 = vsub.f32 %v2586_v51, %v2770_v38 }
 0x20f   :  { %v747_v33 = vmul.f32 %v2833_v57, %v3513_v8  ;;  %v748_v12 = vmul.f32 %v2833_v57, %v3514_v42  ;;  %v749_v1 = vmul.f32 %v2833_v57, %v3515_v31  ;;  %v789_v17 = vmul.f32 %v2809_v27, %v738_v56  ;;  %2066 = vmatmul.msk.bf16.vlgmr.msra.gmra.mxu2 %vm1486_vm15, %v1476_v48 }
 0x210   :  { %v750_v39 = vmul.f32 %v2833_v57, %v3516_v15  ;;  %v790_v50 = vmul.f32 %v2809_v27, %v739_v23  ;;  %v791_v49 = vmul.f32 %v2809_v27, %v740_v9  ;;  %v3518_v37 = vsub.f32 %v3517_v5, %v2770_v38 }
 0x211   :  { %v3520_v25 = vsub.f32 %v3519_v47, %v2770_v38  ;;  %v792_v61 = vmul.f32 %v2809_v27, %v741_v34  ;;  %v793_v21 = vmul.f32 %v2809_v27, %v742_v52  ;;  %v794_v54 = vmul.f32 %v2809_v27, %v743_v40 }
 0x212   :  { %v751_v35 = vmul.f32 %v2833_v57, %v3518_v37  ;;  %v795_v60 = vmul.f32 %v2809_v27, %v744_v43  ;;  %v796_v24 = vmul.f32 %v2809_v27, %v745_v18  ;;  %v797_v41 = vmul.f32 %v2809_v27, %v746_v55 }
 0x213   :  { %v752_v51 = vmul.f32 %v2833_v57, %v3520_v25  ;;  %v798_v16 = vmul.f32 %v2809_v27, %v747_v33  ;;  %v799_v4 = vmul.f32 %v2809_v27, %v748_v12  ;;  %v800_v26 = vmul.f32 %v2809_v27, %v749_v1 }
 0x214   :  { %v839_v13 = vadd.f32 %v3521_v63, %v788_v59  ;;  %v801_v53 = vmul.f32 %v2809_v27, %v750_v39  ;;  %v840_v10 = vadd.f32 %v3521_v63, %v789_v17  ;;  %v841_v19 = vadd.f32 %v3521_v63, %v790_v50 }
 0x215   :  { %v842_v32 = vadd.f32 %v3521_v63, %v791_v49  ;;  %v802_v0 = vmul.f32 %v2809_v27, %v751_v35  ;;  %v803_v3 = vmul.f32 %v2809_v27, %v752_v51  ;;  %v843_v62 = vadd.f32 %v3521_v63, %v792_v61 }
 0x216   :  { %v844_v56 = vadd.f32 %v3521_v63, %v793_v21  ;;  %v845_v20 = vadd.f32 %v3521_v63, %v794_v54  ;;  %v846_v28 = vadd.f32 %v3521_v63, %v795_v60  ;;  %v3066_v30 = vadd.f32 %v3521_v63, %v796_v24 }
 0x217   :  { %v3069_v23 = vadd.f32 %v3521_v63, %v797_v41  ;;  %v3072_v44 = vadd.f32 %v3521_v63, %v798_v16  ;;  %v3075_v9 = vadd.f32 %v3521_v63, %v799_v4  ;;  %v3078_v46 = vadd.f32 %v3521_v63, %v800_v26 }
 0x218   :  { %v889_v36 = vmax.f32 %v839_v13, 0.0  ;;  %v3081_v11 = vadd.f32 %v3521_v63, %v801_v53  ;;  %v890_v34 = vmax.f32 %v840_v10, 0.0  ;;  %v891_v2 = vmax.f32 %v841_v19, 0.0 }
 0x219   :  { %v892_v52 = vmax.f32 %v842_v32, 0.0  ;;  %v3084_v45 = vadd.f32 %v3521_v63, %v802_v0  ;;  %v3087_v6 = vadd.f32 %v3521_v63, %v803_v3  ;;  %v893_v22 = vmax.f32 %v843_v62, 0.0 }
 0x21a   :  { %v894_v40 = vmax.f32 %v844_v56, 0.0  ;;  %v895_v29 = vmax.f32 %v845_v20, 0.0  ;;  %v896_v43 = vmax.f32 %v846_v28, 0.0  ;;  %v897_v7 = vmax.f32 %v3066_v30, 0.0 }
 0x21b   :  { %v898_v58 = vmax.f32 %v3069_v23, 0.0  ;;  %v899_v18 = vmax.f32 %v3072_v44, 0.0  ;;  %v900_v14 = vmax.f32 %v3075_v9, 0.0  ;;  %v901_v55 = vmax.f32 %v3078_v46, 0.0 }
 0x21c   :  { %v1035_v8 = vsel %vm394_vm4, %v889_v36, -inf  ;;  %v1042_v48 = vsel %vm394_vm4, %v890_v34, -inf  ;;  %v1049_v42 = vsel %vm394_vm4, %v891_v2, -inf  ;;  %v1056_v12 = vsel %vm394_vm4, %v892_v52, -inf }
 0x21d   :  { %v1036_v33 = vrot.slane %v1035_v8, 4  ;;  %v1043_v31 = vrot.slane %v1042_v48, 4  ;;  %v1050_v1 = vrot.slane %v1049_v42, 4  ;;  %v1057_v59 = vrot.slane %v1056_v12, 4 }
 0x21e   :  { %v1063_v15 = vsel %vm394_vm4, %v893_v22, -inf  ;;  %v1070_v50 = vsel %vm394_vm4, %v894_v40, -inf  ;;  %v1077_v49 = vsel %vm394_vm4, %v895_v29, -inf  ;;  %v1084_v21 = vsel %vm394_vm4, %v896_v43, -inf }
 0x21f   :  { %v1037_v39 = vmax.f32 %v1035_v8, %v1036_v33  ;;  %v1064_v17 = vrot.slane %v1063_v15, 4  ;;  %v1044_v5 = vmax.f32 %v1042_v48, %v1043_v31  ;;  %v1051_v37 = vmax.f32 %v1049_v42, %v1050_v1 }
 0x220   :  { %v1058_v35 = vmax.f32 %v1056_v12, %v1057_v59  ;;  %v1071_v47 = vrot.slane %v1070_v50, 4  ;;  %v1078_v61 = vrot.slane %v1077_v49, 4  ;;  %v1085_v13 = vrot.slane %v1084_v21, 4 }
 0x221   :  { %v1038_v25 = vrot.slane %v1037_v39, 2  ;;  %v1065_v51 = vmax.f32 %v1063_v15, %v1064_v17  ;;  %v1045_v54 = vrot.slane %v1044_v5, 2  ;;  %v1052_v60 = vrot.slane %v1051_v37, 2 }
 0x222   :  { %v1059_v24 = vrot.slane %v1058_v35, 2  ;;  %v1072_v41 = vmax.f32 %v1070_v50, %v1071_v47  ;;  %v1079_v26 = vmax.f32 %v1077_v49, %v1078_v61  ;;  %v1086_v56 = vmax.f32 %v1084_v21, %v1085_v13 }
 0x223   :  { %v1039_v16 = vmax.f32 %v1037_v39, %v1038_v25  ;;  %v1066_v4 = vrot.slane %v1065_v51, 2  ;;  %v1046_v53 = vmax.f32 %v1044_v5, %v1045_v54  ;;  %v1053_v10 = vmax.f32 %v1051_v37, %v1052_v60 }
 0x224   :  { %v1060_v19 = vmax.f32 %v1058_v35, %v1059_v24  ;;  %v1073_v32 = vrot.slane %v1072_v41, 2  ;;  %v1080_v62 = vrot.slane %v1079_v26, 2  ;;  %v902_v44 = vmax.f32 %v3081_v11, 0.0 }
 0x225   :  { %v1040_v0 = vrot.slane %v1039_v16, 1  ;;  %v1067_v3 = vmax.f32 %v1065_v51, %v1066_v4  ;;  %v1047_v20 = vrot.slane %v1046_v53, 1  ;;  %v1054_v28 = vrot.slane %v1053_v10, 1 }
 0x226   :  { %v1061_v30 = vrot.slane %v1060_v19, 1  ;;  %v1074_v23 = vmax.f32 %v1072_v41, %v1073_v32  ;;  %v1081_v34 = vmax.f32 %v1079_v26, %v1080_v62  ;;  %v1087_v2 = vrot.slane %v1086_v56, 2 }
 0x227   :  { %v1068_v36 = vrot.slane %v1067_v3, 1  ;;  %v903_v52 = vmax.f32 %v3084_v45, 0.0  ;;  %v904_v22 = vmax.f32 %v3087_v6, 0.0  ;;  %v3105_v40 = vmax.f32 %v1039_v16, %v1040_v0 }
 0x228   :  { %v3107_v29 = vmax.f32 %v1046_v53, %v1047_v20  ;;  %v3109_v43 = vmax.f32 %v1053_v10, %v1054_v28  ;;  %v3111_v8 = vmax.f32 %v1060_v19, %v1061_v30  ;;  %v1088_v33 = vmax.f32 %v1086_v56, %v1087_v2 }
 0x229   :  { %v1091_v48 = vsel %vm394_vm4, %v897_v7, -inf  ;;  %v1075_v42 = vrot.slane %v1074_v23, 1  ;;  %v1098_v12 = vsel %vm394_vm4, %v898_v58, -inf  ;;  %v1105_v31 = vsel %vm394_vm4, %v899_v18, -inf }
 0x22a   :  { %v1092_v11 = vrot.slane %v1091_v48, 4  ;;  %v3116_v45 = vmax.f32 %v1067_v3, %v1068_v36  ;;  %v1082_v6 = vrot.slane %v1081_v34, 1  ;;  %v1099_v1 = vrot.slane %v1098_v12, 4 }
 0x22b   :  { %v1106_v59 = vrot.slane %v1105_v31, 4  ;;  %v1112_v39 = vsel %vm394_vm4, %v900_v14, -inf  ;;  %v1119_v7 = vsel %vm394_vm4, %v901_v55, -inf  ;;  %v1126_v17 = vsel %vm394_vm4, %v902_v44, -inf }
 0x22c   :  { %v1093_v15 = vmax.f32 %v1091_v48, %v1092_v11  ;;  %v1089_v50 = vrot.slane %v1088_v33, 1  ;;  %v1100_v58 = vmax.f32 %v1098_v12, %v1099_v1  ;;  %v1113_v18 = vrot.slane %v1112_v39, 4 }
 0x22d   :  { %v1107_v49 = vmax.f32 %v1105_v31, %v1106_v59  ;;  %v1120_v37 = vrot.slane %v1119_v7, 4  ;;  %v1127_v35 = vrot.slane %v1126_v17, 4  ;;  %v1133_v47 = vsel %vm394_vm4, %v903_v52, -inf }
 0x22e   :  { %v1094_v5 = vrot.slane %v1093_v15, 2  ;;  %v1101_v25 = vrot.slane %v1100_v58, 2  ;;  %v1114_v9 = vmax.f32 %v1112_v39, %v1113_v18  ;;  %v1134_v61 = vrot.slane %v1133_v47, 4 }
 0x22f   :  { %v1108_v51 = vrot.slane %v1107_v49, 2  ;;  %v1121_v21 = vmax.f32 %v1119_v7, %v1120_v37  ;;  %v1128_v46 = vmax.f32 %v1126_v17, %v1127_v35  ;;  %v1140_v55 = vsel %vm394_vm4, %v904_v22, -inf  ;;  %v3522_v35 = vld [vmem:[#allocation13_spill] sm:$0xff] }
 0x230   :  { %v1095_v14 = vmax.f32 %v1093_v15, %v1094_v5  ;;  %v1102_v54 = vmax.f32 %v1100_v58, %v1101_v25  ;;  %v1115_v24 = vrot.slane %v1114_v9, 2  ;;  %v1135_v41 = vmax.f32 %v1133_v47, %v1134_v61 }
 0x231   :  { %v1109_v60 = vmax.f32 %v1107_v49, %v1108_v51  ;;  %v1122_v4 = vrot.slane %v1121_v21, 2  ;;  %v1129_v26 = vrot.slane %v1128_v46, 2  ;;  %v1141_v13 = vrot.slane %v1140_v55, 4 }
 0x232   :  { %v1096_v16 = vrot.slane %v1095_v14, 1  ;;  %v1103_v53 = vrot.slane %v1102_v54, 1  ;;  %v1116_v19 = vmax.f32 %v1114_v9, %v1115_v24  ;;  %v1136_v32 = vrot.slane %v1135_v41, 2 }
 0x233   :  { %v1110_v10 = vrot.slane %v1109_v60, 1  ;;  %v1076_v0 = vmax.f32 %v1074_v23, %v1075_v42  ;;  %v1123_v3 = vmax.f32 %v1121_v21, %v1122_v4  ;;  %v1130_v62 = vmax.f32 %v1128_v46, %v1129_v26 }
 0x234   :  { %v1142_v56 = vmax.f32 %v1140_v55, %v1141_v13  ;;  %v1083_v20 = vmax.f32 %v1081_v34, %v1082_v6  ;;  %v1090_v28 = vmax.f32 %v1088_v33, %v1089_v50  ;;  %v1117_v30 = vrot.slane %v1116_v19, 1 }
 0x235   :  { %v1137_v44 = vmax.f32 %v1135_v41, %v1136_v32  ;;  %v1097_v36 = vmax.f32 %v1095_v14, %v1096_v16  ;;  %v1124_v2 = vrot.slane %v1123_v3, 1  ;;  %v1131_v52 = vrot.slane %v1130_v62, 1 }
 0x236   :  { %v1143_v22 = vrot.slane %v1142_v56, 2  ;;  %v1104_v48 = vmax.f32 %v1102_v54, %v1103_v53  ;;  %v1111_v11 = vmax.f32 %v1109_v60, %v1110_v10  ;;  %v1289_v31 = vpack.c.bf16 %v3105_v40, %v3105_v40 }
 0x237   :  { %v1138_v12 = vrot.slane %v1137_v44, 1  ;;  %v1118_v1 = vmax.f32 %v1116_v19, %v1117_v30  ;;  %v1290_v23 = vpack.c.bf16 %v3107_v29, %v3107_v29  ;;  %v1291_v34 = vpack.c.bf16 %v3109_v43, %v3109_v43 }
 0x238   :  { %v1144_v59 = vmax.f32 %v1142_v56, %v1143_v22  ;;  %v1125_v33 = vmax.f32 %v1123_v3, %v1124_v2  ;;  %v1132_v42 = vmax.f32 %v1130_v62, %v1131_v52  ;;  %v1292_v15 = vpack.c.bf16 %v3111_v8, %v3111_v8  ;;  %v3523_v56 = vld [vmem:[#allocation24_spill] sm:$0xff]  ;;  %v3525_v2 = vld [vmem:[#allocation26_spill] sm:$0xff]  ;;  %v3526_v22 = vld [vmem:[#allocation3_spill] sm:$0xff] }
 0x239   :  { %v1139_v6 = vmax.f32 %v1137_v44, %v1138_v12  ;;  %v1293_v7 = vpack.c.bf16 %v3116_v45, %v3116_v45  ;;  %v1294_v17 = vpack.c.bf16 %v1076_v0, %v1076_v0  ;;  %v1297_v40 = vpack.c.bf16 %v1097_v36, %v1097_v36 }
 0x23a   :  { %v1145_v39 = vrot.slane %v1144_v59, 1  ;;  %v1295_v50 = vpack.c.bf16 %v1083_v20, %v1083_v20  ;;  %v1296_v58 = vpack.c.bf16 %v1090_v28, %v1090_v28  ;;  %v1298_v49 = vpack.c.bf16 %v1104_v48, %v1104_v48  ;;  %v3524_v28 = vld [vmem:[#allocation25_spill] sm:$0xff] }
 0x23b   :  { %v1299_v18 = vpack.c.bf16 %v1111_v11, %v1111_v11  ;;  %v1300_v5 = vpack.c.bf16 %v1118_v1, %v1118_v1  ;;  %v1392_v37 = vunpack.c.l.b16 %v1289_v31  ;;  %v1393_v43 = vunpack.c.l.b16 %v1290_v23  ;;  %v3527_v31 = vld [vmem:[#allocation6_spill] sm:$0xff] }
 0x23c   :  { %v1146_v29 = vmax.f32 %v1144_v59, %v1145_v39  ;;  %v701_v47 = vsub.f32 %v3522_v35, %v2770_v38  ;;  %v1301_v25 = vpack.c.bf16 %v1125_v33, %v1125_v33  ;;  %v1302_v51 = vpack.c.bf16 %v1132_v42, %v1132_v42  ;;  %v3528_v59 = vld [vmem:[#allocation4_spill] sm:$0xff]  ;;  %v3529_v42 = vld [vmem:[#allocation7_spill] sm:$0xff] }
 0x23d   :  { %v1394_v8 = vunpack.c.l.b16 %v1291_v34  ;;  %v1303_v9 = vpack.c.bf16 %v1139_v6, %v1139_v6  ;;  %v1395_v14 = vunpack.c.l.b16 %v1292_v15  ;;  %v1400_v45 = vunpack.c.l.b16 %v1297_v40  ;;  %v3530_v15 = vld [vmem:[#allocation5_spill] sm:$0xff] }
 0x23e   :  { %v1304_v61 = vpack.c.bf16 %v1146_v29, %v1146_v29  ;;  %v1396_v21 = vunpack.c.l.b16 %v1293_v7  ;;  %v1397_v46 = vunpack.c.l.b16 %v1294_v17  ;;  %v1401_v55 = vunpack.c.l.b16 %v1298_v49  ;;  %v3531_v17 = vld [vmem:[#allocation14_spill] sm:$0xff] }
 0x23f   :  { %v1402_v54 = vunpack.c.l.b16 %v1299_v18  ;;  %v1398_v60 = vunpack.c.l.b16 %v1295_v50  ;;  %v1399_v24 = vunpack.c.l.b16 %v1296_v58  ;;  %v1403_v41 = vunpack.c.l.b16 %v1300_v5  ;;  %v3532_v50 = vld [vmem:[#allocation15_spill] sm:$0xff] }
 0x240   :  { %v1447_v16 = vsel %vm1426_vm8, %v1393_v43, %v1392_v37  ;;  %v1404_v4 = vunpack.c.l.b16 %v1301_v25  ;;  %v1405_v26 = vunpack.c.l.b16 %v1302_v51  ;;  %v1454_v53 = vsel %vm1426_vm8, %v1401_v55, %v1400_v45  ;;  %v3533_v43 = vld [vmem:[#allocation16_spill] sm:$0xff]  ;;  %v3534_v25 = vld [vmem:[#allocation17_spill] sm:$0xff] }
 0x241   :  { %v1448_v13 = vsel %vm1428_vm9, %v1394_v8, %v1447_v16  ;;  %v1406_v10 = vunpack.c.l.b16 %v1303_v9  ;;  %v1407_v19 = vunpack.c.l.b16 %v1304_v61  ;;  %v1455_v0 = vsel %vm1428_vm9, %v1402_v54, %v1454_v53  ;;  %v3535_v8 = vld [vmem:[#allocation18_spill] sm:$0xff]  ;;  %v3536_v61 = vld [vmem:[#allocation19_spill] sm:$0xff]  ;;  %v3537_v54 = vld [vmem:[#allocation12_spill] sm:$0xff] }
 0x242   :  { %v1449_v32 = vsel %vm1430_vm10, %v1395_v14, %v1448_v13  ;;  %v1456_v62 = vsel %vm1430_vm10, %v1403_v41, %v1455_v0  ;;  %v692_v20 = vsub.f32 %v3523_v56, %v2770_v38  ;;  %v693_v30 = vsub.f32 %v3524_v28, %v2770_v38 }
 0x243   :  { %v1450_v3 = vsel %vm1432_vm11, %v1396_v21, %v1449_v32  ;;  %v1457_v36 = vsel %vm1432_vm11, %v1404_v4, %v1456_v62  ;;  %v694_v52 = vsub.f32 %v3525_v2, %v2770_v38  ;;  %v695_v48 = vsub.f32 %v3526_v22, %v2770_v38 }
 0x244   :  { %v1451_v44 = vsel %vm1434_vm12, %v1397_v46, %v1450_v3  ;;  %v1458_v12 = vsel %vm1434_vm12, %v1405_v26, %v1457_v36  ;;  %v696_v1 = vsub.f32 %v3527_v31, %v2770_v38  ;;  %v697_v23 = vsub.f32 %v3528_v59, %v2770_v38 }
 0x245   :  { %v1452_v11 = vsel %vm1436_vm13, %v1398_v60, %v1451_v44  ;;  %v1459_v33 = vsel %vm1436_vm13, %v1406_v10, %v1458_v12  ;;  %v698_v6 = vsub.f32 %v3529_v42, %v2770_v38  ;;  %v699_v39 = vsub.f32 %v3530_v15, %v2770_v38 }
 0x246   :  { %v1453_v34 = vsel %vm1438_vm14, %v1399_v24, %v1452_v11  ;;  %v1460_v7 = vsel %vm1438_vm14, %v1407_v19, %v1459_v33  ;;  %v702_v40 = vsub.f32 %v3531_v17, %v2770_v38  ;;  %v703_v58 = vsub.f32 %v3532_v50, %v2770_v38 }
 0x247   :  { %v753_v49 = vmul.f32 %v2833_v57, %v692_v20  ;;  %v1477_v18 = vpack.c.b16 %v1460_v7, %v1453_v34  ;;  %v754_v29 = vmul.f32 %v2833_v57, %v693_v30  ;;  %v755_v5 = vmul.f32 %v2833_v57, %v694_v52 }
 0x248   :  { %v756_v37 = vmul.f32 %v2833_v57, %v695_v48  ;;  %v704_v35 = vsub.f32 %v3533_v43, %v2770_v38  ;;  %v705_v51 = vsub.f32 %v3534_v25, %v2770_v38  ;;  %v706_v9 = vsub.f32 %v3535_v8, %v2770_v38 }
 0x249   :  { %v707_v14 = vsub.f32 %v3536_v61, %v2770_v38  ;;  %2067 = vmatmul.msk.bf16.gmra.mxu2 %vm1486_vm15, %v1477_v18  ;;  %v757_v45 = vmul.f32 %v2833_v57, %v696_v1  ;;  %v758_v21 = vmul.f32 %v2833_v57, %v697_v23  ;;  %v759_v46 = vmul.f32 %v2833_v57, %v698_v6 }
 0x24a   :  { %v760_v55 = vmul.f32 %v2833_v57, %v699_v39  ;;  %v3538_v60 = vsub.f32 %v3537_v54, %v2770_v38  ;;  %v762_v41 = vmul.f32 %v2833_v57, %v701_v47  ;;  %v763_v16 = vmul.f32 %v2833_v57, %v702_v40 }
 0x24b   :  { %v764_v4 = vmul.f32 %v2833_v57, %v703_v58  ;;  %v804_v26 = vmul.f32 %v2809_v27, %v753_v49  ;;  %v805_v13 = vmul.f32 %v2809_v27, %v754_v29  ;;  %v806_v53 = vmul.f32 %v2809_v27, %v755_v5 }
 0x24c   :  { %v761_v24 = vmul.f32 %v2833_v57, %v3538_v60  ;;  %v807_v10 = vmul.f32 %v2809_v27, %v756_v37  ;;  %v765_v19 = vmul.f32 %v2833_v57, %v704_v35  ;;  %v766_v32 = vmul.f32 %v2833_v57, %v705_v51 }
 0x24d   :  { %v767_v0 = vmul.f32 %v2833_v57, %v706_v9  ;;  %v768_v47 = vmul.f32 %v2833_v57, %v707_v14  ;;  %v808_v3 = vmul.f32 %v2809_v27, %v757_v45  ;;  %v809_v62 = vmul.f32 %v2809_v27, %v758_v21 }
 0x24e   :  { %v810_v56 = vmul.f32 %v2809_v27, %v759_v46  ;;  %v811_v20 = vmul.f32 %v2809_v27, %v760_v55  ;;  %v812_v28 = vmul.f32 %v2809_v27, %v761_v24  ;;  %v813_v30 = vmul.f32 %v2809_v27, %v762_v41 }
 0x24f   :  { %v814_v44 = vmul.f32 %v2809_v27, %v763_v16  ;;  %v815_v36 = vmul.f32 %v2809_v27, %v764_v4  ;;  %v855_v2 = vadd.f32 %v3521_v63, %v804_v26  ;;  %v856_v52 = vadd.f32 %v3521_v63, %v805_v13 }
 0x250   :  { %v857_v22 = vadd.f32 %v3521_v63, %v806_v53  ;;  %v858_v48 = vadd.f32 %v3521_v63, %v807_v10  ;;  %v816_v11 = vmul.f32 %v2809_v27, %v765_v19  ;;  %v817_v12 = vmul.f32 %v2809_v27, %v766_v32 }
 0x251   :  { %v818_v31 = vmul.f32 %v2809_v27, %v767_v0  ;;  %v819_v1 = vmul.f32 %v2809_v27, %v768_v47  ;;  %v859_v59 = vadd.f32 %v3521_v63, %v808_v3  ;;  %v860_v23 = vadd.f32 %v3521_v63, %v809_v62 }
 0x252   :  { %v861_v34 = vadd.f32 %v3521_v63, %v810_v56  ;;  %v862_v33 = vadd.f32 %v3521_v63, %v811_v20  ;;  %v3226_v42 = vadd.f32 %v3521_v63, %v812_v28  ;;  %v3229_v6 = vadd.f32 %v3521_v63, %v813_v30 }
 0x253   :  { %v3232_v15 = vadd.f32 %v3521_v63, %v814_v44  ;;  %v3235_v39 = vadd.f32 %v3521_v63, %v815_v36  ;;  %v905_v7 = vmax.f32 %v855_v2, 0.0  ;;  %v906_v17 = vmax.f32 %v856_v52, 0.0 }
 0x254   :  { %v907_v40 = vmax.f32 %v857_v22, 0.0  ;;  %v908_v50 = vmax.f32 %v858_v48, 0.0  ;;  %v3238_v58 = vadd.f32 %v3521_v63, %v816_v11  ;;  %v3241_v49 = vadd.f32 %v3521_v63, %v817_v12 }
 0x255   :  { %v3244_v18 = vadd.f32 %v3521_v63, %v818_v31  ;;  %v3247_v29 = vadd.f32 %v3521_v63, %v819_v1  ;;  %v909_v5 = vmax.f32 %v859_v59, 0.0  ;;  %v910_v37 = vmax.f32 %v860_v23, 0.0 }
 0x256   :  { %v911_v43 = vmax.f32 %v861_v34, 0.0  ;;  %v912_v35 = vmax.f32 %v862_v33, 0.0  ;;  %v913_v25 = vmax.f32 %v3226_v42, 0.0  ;;  %v914_v51 = vmax.f32 %v3229_v6, 0.0 }
 0x257   :  { %v915_v8 = vmax.f32 %v3232_v15, 0.0  ;;  %v916_v9 = vmax.f32 %v3235_v39, 0.0  ;;  %v1147_v61 = vsel %vm394_vm4, %v905_v7, -inf  ;;  %v1154_v14 = vsel %vm394_vm4, %v906_v17, -inf }
 0x258   :  { %v1161_v45 = vsel %vm394_vm4, %v907_v40, -inf  ;;  %v1168_v21 = vsel %vm394_vm4, %v908_v50, -inf  ;;  %v1148_v46 = vrot.slane %v1147_v61, 4  ;;  %v1155_v55 = vrot.slane %v1154_v14, 4 }
 0x259   :  { %v1162_v54 = vrot.slane %v1161_v45, 4  ;;  %v1169_v60 = vrot.slane %v1168_v21, 4  ;;  %v1175_v24 = vsel %vm394_vm4, %v909_v5, -inf  ;;  %v1182_v41 = vsel %vm394_vm4, %v910_v37, -inf }
 0x25a   :  { %v1189_v16 = vsel %vm394_vm4, %v911_v43, -inf  ;;  %v1196_v4 = vsel %vm394_vm4, %v912_v35, -inf  ;;  %v1149_v26 = vmax.f32 %v1147_v61, %v1148_v46  ;;  %v1156_v13 = vmax.f32 %v1154_v14, %v1155_v55 }
 0x25b   :  { %v1163_v53 = vmax.f32 %v1161_v45, %v1162_v54  ;;  %v1170_v10 = vmax.f32 %v1168_v21, %v1169_v60  ;;  %v1176_v19 = vrot.slane %v1175_v24, 4  ;;  %v1183_v32 = vrot.slane %v1182_v41, 4 }
 0x25c   :  { %v1190_v0 = vrot.slane %v1189_v16, 4  ;;  %v1197_v47 = vrot.slane %v1196_v4, 4  ;;  %v1150_v3 = vrot.slane %v1149_v26, 2  ;;  %v1157_v62 = vrot.slane %v1156_v13, 2 }
 0x25d   :  { %v1164_v56 = vrot.slane %v1163_v53, 2  ;;  %v1171_v20 = vrot.slane %v1170_v10, 2  ;;  %v1177_v28 = vmax.f32 %v1175_v24, %v1176_v19  ;;  %v1184_v30 = vmax.f32 %v1182_v41, %v1183_v32 }
 0x25e   :  { %v1191_v44 = vmax.f32 %v1189_v16, %v1190_v0  ;;  %v1198_v36 = vmax.f32 %v1196_v4, %v1197_v47  ;;  %v1151_v2 = vmax.f32 %v1149_v26, %v1150_v3  ;;  %v1158_v52 = vmax.f32 %v1156_v13, %v1157_v62 }
 0x25f   :  { %v1165_v22 = vmax.f32 %v1163_v53, %v1164_v56  ;;  %v1172_v48 = vmax.f32 %v1170_v10, %v1171_v20  ;;  %v1178_v11 = vrot.slane %v1177_v28, 2  ;;  %v1185_v12 = vrot.slane %v1184_v30, 2 }
 0x260   :  { %v1192_v31 = vrot.slane %v1191_v44, 2  ;;  %v1199_v1 = vrot.slane %v1198_v36, 2  ;;  %v1152_v59 = vrot.slane %v1151_v2, 1  ;;  %v1159_v23 = vrot.slane %v1158_v52, 1 }
 0x261   :  { %v1166_v34 = vrot.slane %v1165_v22, 1  ;;  %v1173_v33 = vrot.slane %v1172_v48, 1  ;;  %v1179_v42 = vmax.f32 %v1177_v28, %v1178_v11  ;;  %v3261_v6 = vmax.f32 %v1184_v30, %v1185_v12 }
 0x262   :  { %v3263_v15 = vmax.f32 %v1191_v44, %v1192_v31  ;;  %v3265_v39 = vmax.f32 %v1198_v36, %v1199_v1  ;;  %v917_v7 = vmax.f32 %v3238_v58, 0.0  ;;  %v918_v17 = vmax.f32 %v3241_v49, 0.0 }
 0x263   :  { %v919_v40 = vmax.f32 %v3244_v18, 0.0  ;;  %v920_v50 = vmax.f32 %v3247_v29, 0.0  ;;  %v3271_v5 = vmax.f32 %v1151_v2, %v1152_v59  ;;  %v3273_v37 = vmax.f32 %v1158_v52, %v1159_v23 }
 0x264   :  { %v3275_v43 = vmax.f32 %v1165_v22, %v1166_v34  ;;  %v3277_v35 = vmax.f32 %v1172_v48, %v1173_v33  ;;  %v1203_v61 = vsel %vm394_vm4, %v913_v25, -inf  ;;  %v1210_v14 = vsel %vm394_vm4, %v914_v51, -inf }
 0x265   :  { %v1217_v58 = vsel %vm394_vm4, %v915_v8, -inf  ;;  %v1224_v49 = vsel %vm394_vm4, %v916_v9, -inf  ;;  %v1180_v45 = vrot.slane %v1179_v42, 1  ;;  %v1187_v18 = vrot.slane %v3261_v6, 1 }
 0x266   :  { %v1194_v29 = vrot.slane %v3263_v15, 1  ;;  %v1201_v21 = vrot.slane %v3265_v39, 1  ;;  %v1204_v46 = vrot.slane %v1203_v61, 4  ;;  %v1211_v55 = vrot.slane %v1210_v14, 4 }
 0x267   :  { %v1218_v54 = vrot.slane %v1217_v58, 4  ;;  %v1225_v60 = vrot.slane %v1224_v49, 4  ;;  %v1231_v24 = vsel %vm394_vm4, %v917_v7, -inf  ;;  %v1238_v25 = vsel %vm394_vm4, %v918_v17, -inf }
 0x268   :  { %v1245_v51 = vsel %vm394_vm4, %v919_v40, -inf  ;;  %v1252_v8 = vsel %vm394_vm4, %v920_v50, -inf  ;;  %v1205_v9 = vmax.f32 %v1203_v61, %v1204_v46  ;;  %v1212_v41 = vmax.f32 %v1210_v14, %v1211_v55 }
 0x269   :  { %v1219_v16 = vmax.f32 %v1217_v58, %v1218_v54  ;;  %v1226_v4 = vmax.f32 %v1224_v49, %v1225_v60  ;;  %v1232_v26 = vrot.slane %v1231_v24, 4  ;;  %v1239_v13 = vrot.slane %v1238_v25, 4 }
 0x26a   :  { %v1246_v53 = vrot.slane %v1245_v51, 4  ;;  %v1253_v10 = vrot.slane %v1252_v8, 4  ;;  %v1206_v19 = vrot.slane %v1205_v9, 2  ;;  %v1213_v32 = vrot.slane %v1212_v41, 2 }
 0x26b   :  { %v1220_v0 = vrot.slane %v1219_v16, 2  ;;  %v1227_v47 = vrot.slane %v1226_v4, 2  ;;  %v1233_v3 = vmax.f32 %v1231_v24, %v1232_v26  ;;  %v1240_v62 = vmax.f32 %v1238_v25, %v1239_v13 }
 0x26c   :  { %v1247_v56 = vmax.f32 %v1245_v51, %v1246_v53  ;;  %v1254_v20 = vmax.f32 %v1252_v8, %v1253_v10  ;;  %v1207_v28 = vmax.f32 %v1205_v9, %v1206_v19  ;;  %v1214_v30 = vmax.f32 %v1212_v41, %v1213_v32 }
 0x26d   :  { %v1221_v44 = vmax.f32 %v1219_v16, %v1220_v0  ;;  %v1228_v36 = vmax.f32 %v1226_v4, %v1227_v47  ;;  %v1234_v2 = vrot.slane %v1233_v3, 2  ;;  %v1241_v52 = vrot.slane %v1240_v62, 2 }
 0x26e   :  { %v1248_v22 = vrot.slane %v1247_v56, 2  ;;  %v1255_v48 = vrot.slane %v1254_v20, 2  ;;  %v1208_v11 = vrot.slane %v1207_v28, 1  ;;  %v1215_v12 = vrot.slane %v1214_v30, 1 }
 0x26f   :  { %v1222_v31 = vrot.slane %v1221_v44, 1  ;;  %v1229_v1 = vrot.slane %v1228_v36, 1  ;;  %v1235_v59 = vmax.f32 %v1233_v3, %v1234_v2  ;;  %v1242_v23 = vmax.f32 %v1240_v62, %v1241_v52  ;;  %v3540_v2 = vld [vmem:[#allocation21_spill] sm:$0xff] }
 0x270   :  { %v1249_v34 = vmax.f32 %v1247_v56, %v1248_v22  ;;  %v1256_v33 = vmax.f32 %v1254_v20, %v1255_v48  ;;  %v1181_v7 = vmax.f32 %v1179_v42, %v1180_v45  ;;  %v1209_v17 = vmax.f32 %v1207_v28, %v1208_v11 }
 0x271   :  { %v1216_v40 = vmax.f32 %v1214_v30, %v1215_v12  ;;  %v1223_v50 = vmax.f32 %v1221_v44, %v1222_v31  ;;  %v1236_v61 = vrot.slane %v1235_v59, 1  ;;  %v1243_v14 = vrot.slane %v1242_v23, 1  ;;  %v3539_v44 = vld [vmem:[#allocation20_spill] sm:$0xff] }
 0x272   :  { %v1250_v58 = vrot.slane %v1249_v34, 1  ;;  %v1257_v49 = vrot.slane %v1256_v33, 1  ;;  %v1188_v46 = vmax.f32 %v3261_v6, %v1187_v18  ;;  %v1195_v55 = vmax.f32 %v3263_v15, %v1194_v29 }
 0x273   :  { %v1202_v54 = vmax.f32 %v3265_v39, %v1201_v21  ;;  %v1230_v60 = vmax.f32 %v1228_v36, %v1229_v1  ;;  %v1237_v24 = vmax.f32 %v1235_v59, %v1236_v61  ;;  %v1244_v25 = vmax.f32 %v1242_v23, %v1243_v14 }
 0x274   :  { %v1305_v51 = vpack.c.bf16 %v3271_v5, %v3271_v5  ;;  %v1306_v42 = vpack.c.bf16 %v3273_v37, %v3273_v37  ;;  %v1251_v45 = vmax.f32 %v1249_v34, %v1250_v58  ;;  %v1258_v8 = vmax.f32 %v1256_v33, %v1257_v49 }
 0x275   :  { %v1307_v9 = vpack.c.bf16 %v3275_v43, %v3275_v43  ;;  %v1308_v6 = vpack.c.bf16 %v3277_v35, %v3277_v35  ;;  %v1309_v15 = vpack.c.bf16 %v1181_v7, %v1181_v7  ;;  %v1313_v18 = vpack.c.bf16 %v1209_v17, %v1209_v17 }
 0x276   :  { %v1314_v39 = vpack.c.bf16 %v1216_v40, %v1216_v40  ;;  %v1315_v29 = vpack.c.bf16 %v1223_v50, %v1223_v50  ;;  %v1310_v21 = vpack.c.bf16 %v1188_v46, %v1188_v46  ;;  %v1311_v41 = vpack.c.bf16 %v1195_v55, %v1195_v55 }
 0x277   :  { %v1312_v16 = vpack.c.bf16 %v1202_v54, %v1202_v54  ;;  %v1316_v4 = vpack.c.bf16 %v1230_v60, %v1230_v60  ;;  %v1317_v5 = vpack.c.bf16 %v1237_v24, %v1237_v24  ;;  %v1318_v26 = vpack.c.bf16 %v1244_v25, %v1244_v25 }
 0x278   :  { %v1408_v13 = vunpack.c.l.b16 %v1305_v51  ;;  %v1409_v37 = vunpack.c.l.b16 %v1306_v42  ;;  %v1319_v53 = vpack.c.bf16 %v1251_v45, %v1251_v45  ;;  %v1320_v10 = vpack.c.bf16 %v1258_v8, %v1258_v8 }
 0x279   :  { %v1410_v19 = vunpack.c.l.b16 %v1307_v9  ;;  %v1411_v32 = vunpack.c.l.b16 %v1308_v6  ;;  %v1412_v43 = vunpack.c.l.b16 %v1309_v15  ;;  %v1416_v0 = vunpack.c.l.b16 %v1313_v18 }
 0x27a   :  { %v1417_v47 = vunpack.c.l.b16 %v1314_v39  ;;  %v1418_v35 = vunpack.c.l.b16 %v1315_v29  ;;  %v1413_v3 = vunpack.c.l.b16 %v1310_v21  ;;  %v1414_v62 = vunpack.c.l.b16 %v1311_v41 }
 0x27b   :  { %v1415_v56 = vunpack.c.l.b16 %v1312_v16  ;;  %v1419_v20 = vunpack.c.l.b16 %v1316_v4  ;;  %v1461_v28 = vsel %vm1426_vm8, %v1409_v37, %v1408_v13  ;;  %v708_v36 = vsub.f32 %v3539_v44, %v2770_v38 }
 0x27c   :  { %v1468_v30 = vsel %vm1426_vm8, %v1417_v47, %v1416_v0  ;;  %v709_v52 = vsub.f32 %v3540_v2, %v2770_v38  ;;  %v1420_v22 = vunpack.c.l.b16 %v1317_v5  ;;  %v1421_v48 = vunpack.c.l.b16 %v1318_v26 }
 0x27d   :  { %v1462_v11 = vsel %vm1428_vm9, %v1410_v19, %v1461_v28  ;;  %v1469_v12 = vsel %vm1428_vm9, %v1418_v35, %v1468_v30  ;;  %v769_v59 = vmul.f32 %v2833_v57, %v708_v36  ;;  %v1422_v34 = vunpack.c.l.b16 %v1319_v53 }
 0x27e   :  { %v1463_v31 = vsel %vm1430_vm10, %v1411_v32, %v1462_v11  ;;  %v1470_v1 = vsel %vm1430_vm10, %v1419_v20, %v1469_v12  ;;  %v770_v23 = vmul.f32 %v2833_v57, %v709_v52  ;;  %v1423_v33 = vunpack.c.l.b16 %v1320_v10 }
 0x27f   :  { %v1464_v7 = vsel %vm1432_vm11, %v1412_v43, %v1463_v31  ;;  %v1471_v38 = vsel %vm1432_vm11, %v1420_v22, %v1470_v1  ;;  %v820_v50 = vmul.f32 %v2809_v27, %v769_v59  ;;  %v3333_v43 = vld [vmem:[%s3438_s6] sm:$0xff] }
 0x280   :  { %v1465_v17 = vsel %vm1434_vm12, %v1413_v3, %v1464_v7  ;;  %v1472_v40 = vsel %vm1434_vm12, %v1421_v48, %v1471_v38  ;;  %v821_v61 = vmul.f32 %v2809_v27, %v770_v23  ;;  %v1325_v0 = vperm.slane %v3333_v43, 3 }
 0x281   :  { %v1466_v14 = vsel %vm1436_vm13, %v1414_v62, %v1465_v17  ;;  %v1473_v58 = vsel %vm1436_vm13, %v1422_v34, %v1472_v40  ;;  %v871_v46 = vadd.f32 %v3521_v63, %v820_v50 }
 0x282   :  { %v1467_v57 = vsel %vm1438_vm14, %v1415_v56, %v1466_v14  ;;  %v1474_v49 = vsel %vm1438_vm14, %v1423_v33, %v1473_v58  ;;  %v872_v55 = vadd.f32 %v3521_v63, %v821_v61 }
 0x283   :  { %v1478_v54 = vpack.c.b16 %v1474_v49, %v1467_v57  ;;  %v921_v60 = vmax.f32 %v871_v46, 0.0 }
 0x284   :  { %v922_v24 = vmax.f32 %v872_v55, 0.0 }
 0x285   :  { %2068 = vmatmul.msk.bf16.gmra.mxu2 %vm1486_vm15, %v1478_v54  ;;  %v1259_v25 = vsel %vm394_vm4, %v921_v60, -inf }
 0x286   :  { %v1266_v27 = vsel %vm394_vm4, %v922_v24, -inf  ;;  %v1260_v51 = vrot.slane %v1259_v25, 4  ;;  %vm1705_vm4 = vcmask 1043456  }
 0x287   :  { %v1267_v42 = vrot.slane %v1266_v27, 4 }
 0x288   :  { %v1261_v45 = vmax.f32 %v1259_v25, %v1260_v51 }
 0x289   :  { %v1268_v8 = vmax.f32 %v1266_v27, %v1267_v42 }
 0x28a   :  { %v1262_v9 = vrot.slane %v1261_v45, 2 }
 0x28b   :  { %v1269_v6 = vrot.slane %v1268_v8, 2 }
 0x28c   :  { %v1263_v15 = vmax.f32 %v1261_v45, %v1262_v9 }
 0x28d   :  { %v1270_v18 = vmax.f32 %v1268_v8, %v1269_v6 }
 0x28e   :  { %v1264_v39 = vrot.slane %v1263_v15, 1 }
 0x28f   :  { %v1271_v29 = vrot.slane %v1270_v18, 1 }
 0x290   :  { %v1265_v63 = vmax.f32 %v1263_v15, %v1264_v39 }
 0x291   :  { %v1272_v21 = vmax.f32 %v1270_v18, %v1271_v29 }
 0x292   :  { %v1321_v41 = vpack.c.bf16 %v1265_v63, %v1265_v63  ;;  %v1508_v37 = vpop.f32.mrf.mxu2 }
 0x293   :  { %v1322_v16 = vpack.c.bf16 %v1272_v21, %v1272_v21  ;;  %v3338_v35 = vadd.f32 %v1508_v37, %v1325_v0 }
 0x294   :  { %v1424_v4 = vunpack.c.l.b16 %v1321_v41 }
 0x295   :  { %v1425_v5 = vunpack.c.l.b16 %v1322_v16  ;;  %v1547_v28 = vmul.f32 %v3338_v35, %v3338_v35  ;;  %v1527_v2 = vsel %vm1486_vm15, %v3338_v35, 0.0  ;;  %v2094_v16 = vld [vmem:[%s3440_s4] sm:$0xff] }
 0x296   :  { %1658 = vmatpush.bf16.msra.mxu3 %v2094_v16 }
 0x297   :  { %v1475_v26 = vsel %vm1426_vm8, %v1425_v5, %v1424_v4  ;;  %v1554_v31 = vsel %vm1486_vm15, %v1547_v28, 0.0 }
 0x298   :  { %v1479_v13 = vpack.c.b16 %v1475_v26, %v1475_v26 }
 0x29a   :  { %2069 = vmatmul.msk.bf16.gmra.mxu2 %vm1486_vm15, %v1479_v13  ;;  %v1510_v53 = vpop.f32.mrf.mxu2 }
 0x29b   :  { %v3336_v47 = vadd.f32 %v1510_v53, %v1325_v0 }
 0x29d   :  { %v1548_v62 = vmul.f32 %v3336_v47, %v3336_v47  ;;  %v1528_v30 = vsel %vm1486_vm15, %v3336_v47, 0.0 }
 0x29e   :  { %v1529_v12 = vadd.f32 %v1528_v30, %v1527_v2 }
 0x29f   :  { %v1555_v52 = vsel %vm1486_vm15, %v1548_v62, 0.0 }
 0x2a0   :  { %v1556_v34 = vadd.f32 %v1555_v52, %v1554_v31 }
 0x2cc   :  { %v1513_v10 = vpop.f32.mrf.mxu2 }
 0x2cd   :  { %v3340_v3 = vadd.f32 %v1513_v10, %v1325_v0 }
 0x2cf   :  { %v1549_v44 = vmul.f32 %v3340_v3, %v3340_v3  ;;  %v1530_v22 = vsel %vm1486_vm15, %v3340_v3, 0.0 }
 0x2d0   :  { %v1531_v33 = vadd.f32 %v1530_v22, %v1529_v12 }
 0x2d1   :  { %v1557_v1 = vsel %vm1486_vm15, %v1549_v44, 0.0 }
 0x2d2   :  { %v1558_v40 = vadd.f32 %v1557_v1, %v1556_v34  ;;  %v1611_v34 = vperm.slane %v3333_v43, 5 }
 0x2d4   :  { %v1515_v19 = vpop.f32.mrf.mxu2 }
 0x2d5   :  { %v3344_v56 = vadd.f32 %v1515_v19, %v1325_v0 }
 0x2d7   :  { %v1550_v48 = vmul.f32 %v3344_v56, %v3344_v56  ;;  %v1532_v59 = vsel %vm1486_vm15, %v3344_v56, 0.0 }
 0x2d8   :  { %v1533_v50 = vadd.f32 %v1532_v59, %v1531_v33 }
 0x2d9   :  { %v1559_v7 = vsel %vm1486_vm15, %v1550_v48, 0.0  ;;  %v1603_v48 = vperm.slane %v3333_v43, 4 }
 0x2da   :  { %v1560_v58 = vadd.f32 %v1559_v7, %v1558_v40 }
 0x308   :  { %v1518_v32 = vpop.f32.mrf.mxu2 }
 0x309   :  { %v3352_v36 = vadd.f32 %v1518_v32, %v1325_v0 }
 0x30b   :  { %v1551_v23 = vmul.f32 %v3352_v36, %v3352_v36  ;;  %v1534_v38 = vsel %vm1486_vm15, %v3352_v36, 0.0 }
 0x30c   :  { %v1535_v57 = vadd.f32 %v1534_v38, %v1533_v50 }
 0x30d   :  { %v1561_v61 = vsel %vm1486_vm15, %v1551_v23, 0.0 }
 0x30e   :  { %v1562_v54 = vadd.f32 %v1561_v61, %v1560_v58 }
 0x310   :  { %v1520_v20 = vpop.f32.mrf.mxu2 }
 0x311   :  { %v3361_v11 = vadd.f32 %v1520_v20, %v1325_v0 }
 0x313   :  { %v1552_v17 = vmul.f32 %v3361_v11, %v3361_v11  ;;  %v1536_v14 = vsel %vm1486_vm15, %v3361_v11, 0.0 }
 0x314   :  { %v1537_v60 = vadd.f32 %v1536_v14, %v1535_v57 }
 0x315   :  { %v1563_v46 = vsel %vm1486_vm15, %v1552_v17, 0.0 }
 0x316   :  { %v1564_v27 = vadd.f32 %v1563_v46, %v1562_v54 }
 0x31d   :  { %v1523_v49 = vpop.f32.mrf.mxu2 }
 0x31e   :  { %v3378_v55 = vadd.f32 %v1523_v49, %v1325_v0 }
 0x320   :  { %v1539_v24 = vsel %vm1538_vm0, %v3378_v55, 0.0  ;;  %v1553_v25 = vmul.f32 %v3378_v55, %v3378_v55 }
 0x321   :  { %v1540_v51 = vadd.f32 %v1539_v24, %v1537_v60 }
 0x322   :  { %v1565_v42 = vsel %vm1538_vm0, %v1553_v25, 0.0 }
 0x323   :  { %v1541_v45 = vrot.slane %v1540_v51, 4  ;;  %v1566_v8 = vadd.f32 %v1565_v42, %v1564_v27 }
 0x325   :  { %v1542_v9 = vadd.f32 %v1541_v45, %v1540_v51  ;;  %v1567_v6 = vrot.slane %v1566_v8, 4  ;;  %v1525_v15 = vpop.f32.mrf.mxu2 }
 0x327   :  { %v1543_v18 = vrot.slane %v1542_v9, 2  ;;  %v1568_v39 = vadd.f32 %v1567_v6, %v1566_v8 }
 0x329   :  { %v1544_v29 = vadd.f32 %v1543_v18, %v1542_v9  ;;  %v1569_v63 = vrot.slane %v1568_v39, 2 }
 0x32b   :  { %v1545_v21 = vrot.slane %v1544_v29, 1  ;;  %v1570_v41 = vadd.f32 %v1569_v63, %v1568_v39  ;;  %v1690_v39 = vld [vmem:[%s3441_s5] sm:$0xf] }
 0x32d   :  { %v1546_v4 = vadd.f32 %v1545_v21, %v1544_v29  ;;  %v1571_v5 = vrot.slane %v1570_v41, 1  ;;  %v1707_v29 = vsel %vm1705_vm4, %v1690_v39, 0  ;;  %v1632_v21 = vperm.slane %v3333_v43, 6 }
 0x32e   :  { %1716 = vmatpush.bf16.msra.mxu0 %v1707_v29 }
 0x32f   :  { %v1572_v26 = vadd.f32 %v1571_v5, %v1570_v41  ;;  %v1573_v13 = vmul.f32 0.02, %v1546_v4 }
 0x331   :  { %v1574_v37 = vmul.f32 0.02, %v1572_v26  ;;  %v1575_v53 = vmul.f32 %v1573_v13, %v1573_v13  ;;  %v1584_v10 = vsub.f32 %v3378_v55, %v1573_v13  ;;  %v1578_v52 = vsub.f32 %v3338_v35, %v1573_v13 }
 0x332   :  { %v1579_v22 = vsub.f32 %v3336_v47, %v1573_v13  ;;  %v1582_v31 = vsub.f32 %v3352_v36, %v1573_v13  ;;  %v1583_v1 = vsub.f32 %v3361_v11, %v1573_v13  ;;  %v1580_v36 = vsub.f32 %v3340_v3, %v1573_v13 }
 0x333   :  { %v1576_v19 = vsub.f32 %v1574_v37, %v1575_v53  ;;  %v1581_v11 = vsub.f32 %v3344_v56, %v1573_v13 }
 0x335   :  { %v1577_v32 = vmax.f32 %v1576_v19, 0.0 }
 0x337   :  { %v1585_v0 = vadd.f32 1e-05, %v1577_v32 }
 0x339   :  { %2109 = vrsqrt.f32 %v1585_v0  ;;  %vm1592_vm2 = vweird.f32 %v1585_v0 }
 0x33f   :  { %v2110_v62 = vpop.eup %2109 }
 0x340   :  { %v1587_v20 = vmul.f32 %v2110_v62, %v1585_v0  ;;  %vm1593_vm1 = vweird.f32 %v2110_v62 }
 0x341   :  { %vm1594_vm3 = vmor %vm1592_vm2, %vm1593_vm1 }
 0x342   :  { %v1588_v28 = vmul.f32 %v2110_v62, %v1587_v20 }
 0x344   :  { %v1589_v30 = vmul.f32 0.5, %v1588_v28 }
 0x346   :  { %v1590_v44 = vsub.f32 1.5, %v1589_v30 }
 0x348   :  { %v1591_v2 = vmul.f32 %v2110_v62, %v1590_v44 }
 0x34a   :  { %v1595_v12 = vsel %vm1594_vm3, %v2110_v62, %v1591_v2 }
 0x34b   :  { %v1596_v59 = vmul.f32 %v1595_v12, %v1578_v52  ;;  %v1597_v23 = vmul.f32 %v1595_v12, %v1579_v22  ;;  %v1600_v33 = vmul.f32 %v1595_v12, %v1582_v31  ;;  %v1601_v7 = vmul.f32 %v1595_v12, %v1583_v1 }
 0x34c   :  { %v1598_v54 = vmul.f32 %v1595_v12, %v1580_v36  ;;  %v1599_v60 = vmul.f32 %v1595_v12, %v1581_v11  ;;  %v1602_v3 = vmul.f32 %v1595_v12, %v1584_v10 }
 0x34d   :  { %v1604_v38 = vmul.f32 %v1603_v48, %v1596_v59  ;;  %v1605_v17 = vmul.f32 %v1603_v48, %v1597_v23  ;;  %v1608_v40 = vmul.f32 %v1603_v48, %v1600_v33  ;;  %v1609_v50 = vmul.f32 %v1603_v48, %v1601_v7 }
 0x34e   :  { %v1606_v25 = vmul.f32 %v1603_v48, %v1598_v54  ;;  %v1607_v27 = vmul.f32 %v1603_v48, %v1599_v60  ;;  %v1610_v56 = vmul.f32 %v1603_v48, %v1602_v3  ;;  %v3408_v23 = vperm.slane %v3333_v43, 7 }
 0x34f   :  { %v1612_v35 = vadd.f32 %v1611_v34, %v1604_v38  ;;  %v1613_v61 = vadd.f32 %v1611_v34, %v1605_v17  ;;  %v1616_v47 = vadd.f32 %v1611_v34, %v1608_v40  ;;  %v1617_v14 = vadd.f32 %v1611_v34, %v1609_v50 }
 0x350   :  { %v1614_v51 = vadd.f32 %v1611_v34, %v1606_v25  ;;  %v1615_v42 = vadd.f32 %v1611_v34, %v1607_v27  ;;  %v1618_v6 = vadd.f32 %v1611_v34, %v1610_v56 }
 0x351   :  { %v1619_v58 = vmax.f32 %v1612_v35, 0.0  ;;  %v1620_v57 = vmax.f32 %v1613_v61, 0.0  ;;  %v1623_v49 = vmax.f32 %v1616_v47, 0.0  ;;  %v1624_v46 = vmax.f32 %v1617_v14, 0.0 }
 0x352   :  { %v1621_v45 = vmax.f32 %v1614_v51, 0.0  ;;  %v1622_v8 = vmax.f32 %v1615_v42, 0.0  ;;  %v1625_v15 = vmax.f32 %v1618_v6, 0.0 }
 0x353   :  { %v1626_v55 = vpack.c.bf16 %v1620_v57, %v1619_v58  ;;  %v1628_v24 = vpack.c.bf16 %v1624_v46, %v1623_v49 }
 0x354   :  { %v1627_v9 = vpack.c.bf16 %v1622_v8, %v1621_v45  ;;  %v1629_v18 = vpack.c.bf16 %v1625_v15, %v1625_v15 }
 0x355   :  { %2074 = vmatmul.msk.bf16.vlgmr.msra.gmra.mxu3 %vm1486_vm15, %v1626_v55 }
 0x365   :  { %2075 = vmatmul.msk.bf16.gmra.mxu3 %vm1486_vm15, %v1627_v9 }
 0x375   :  { %2076 = vmatmul.msk.bf16.gmra.mxu3 %vm1486_vm15, %v1628_v24 }
 0x385   :  { %2077 = vmatmul.msk.bf16.gmra.mxu3 %vm1486_vm15, %v1629_v18 }
 0x3d8   :  { %v1660_v63 = vpop.f32.mrf.mxu3 }
 0x3d9   :  { %v1661_v41 = vadd.f32 %v1660_v63, %v1632_v21 }
 0x3db   :  { %v1679_v5 = vmax.f32 %v1661_v41, 0.0 }
 0x3e0   :  { %v1662_v16 = vpop.f32.mrf.mxu3 }
 0x3e1   :  { %v1663_v4 = vadd.f32 %v1662_v16, %v1632_v21 }
 0x3e3   :  { %v1680_v26 = vmax.f32 %v1663_v4, 0.0 }
 0x3e5   :  { %v1686_v13 = vpack.c.bf16 %v1680_v26, %v1679_v5 }
 0x3e7   :  { %2078 = vmatmul.msk.bf16.vlgmr.msra.gmra.mxu0 %vm1692_vm5, %v1686_v13 }
 0x3e8   :  { %v1665_v37 = vpop.f32.mrf.mxu3 }
 0x3e9   :  { %v1666_v53 = vadd.f32 %v1665_v37, %v1632_v21 }
 0x3eb   :  { %v1681_v32 = vmax.f32 %v1666_v53, 0.0 }
 0x3f0   :  { %v1667_v10 = vpop.f32.mrf.mxu3 }
 0x3f1   :  { %v1668_v19 = vadd.f32 %v1667_v10, %v1632_v21 }
 0x3f3   :  { %v1682_v0 = vmax.f32 %v1668_v19, 0.0 }
 0x3f5   :  { %v1687_v62 = vpack.c.bf16 %v1682_v0, %v1681_v32 }
 0x3f7   :  { %2079 = vmatmul.msk.bf16.gmra.mxu0 %vm1692_vm5, %v1687_v62 }
 0x3f8   :  { %v1670_v20 = vpop.f32.mrf.mxu3 }
 0x3f9   :  { %v1671_v28 = vadd.f32 %v1670_v20, %v1632_v21 }
 0x3fb   :  { %v1683_v2 = vmax.f32 %v1671_v28, 0.0 }
 0x400   :  { %v1672_v30 = vpop.f32.mrf.mxu3 }
 0x401   :  { %v1673_v44 = vadd.f32 %v1672_v30, %v1632_v21 }
 0x403   :  { %v1684_v52 = vmax.f32 %v1673_v44, 0.0 }
 0x405   :  { %v1688_v22 = vpack.c.bf16 %v1684_v52, %v1683_v2 }
 0x407   :  { %2080 = vmatmul.msk.bf16.gmra.mxu0 %vm1692_vm5, %v1688_v22 }
 0x408   :  { %v1675_v48 = vpop.f32.mrf.mxu3 }
 0x409   :  { %v1676_v12 = vadd.f32 %v1675_v48, %v1632_v21 }
 0x40b   :  { %v1685_v1 = vmax.f32 %v1676_v12, 0.0 }
 0x40d   :  { %v1689_v59 = vpack.c.bf16 %v1685_v1, %v1685_v1 }
 0x410   :  { %v1677_v31 = vpop.f32.mrf.mxu3 }
 0x417   :  { %2081 = vmatmul.msk.bf16.gmra.mxu0 %vm1692_vm5, %v1689_v59 }
 0x464   :  { %v1718_v34 = vpop.f32.mrf.mxu0 }
 0x465   :  { %v1719_v33 = vadd.f32 %v1718_v34, %v3408_v23 }
 0x467   :  { %v2082_v7 = vmul.f32 -1.442695, %v1719_v33 }
 0x469   :  { %2111 = vpow2.f32 %v2082_v7 }
 0x46c   :  { %v1720_v40 = vpop.f32.mrf.mxu0 }
 0x46d   :  { %v1721_v50 = vadd.f32 %v1720_v40, %v3408_v23 }
 0x46f   :  { %v2112_v38 = vpop.eup %2111  ;;  %v2083_v35 = vmul.f32 -1.442695, %v1721_v50 }
 0x470   :  { %v1758_v17 = vadd.f32 1.0, %v2112_v38 }
 0x472   :  { %2113 = vrcp.f32 %v1758_v17  ;;  %v1776_v58 = vand.u32 2147483648, %v1758_v17  ;;  %v1774_v36 = vand.u32 2147483647, %v1758_v17  ;;  %vm1770_vm7 = vweird.f32 %v1758_v17 }
 0x473   :  { %2115 = vpow2.f32 %v2083_v35 }
 0x474   :  { %v1777_v46 = vor.u32 1.1754944e-38, %v1776_v58  ;;  %vm1775_vm0 = vcmp.eq.f32.partialorder %v1774_v36, 8.507059e+37  ;;  %v1723_v45 = vpop.f32.mrf.mxu0 }
 0x475   :  { %v1724_v9 = vadd.f32 %v1723_v45, %v3408_v23 }
 0x477   :  { %v2084_v15 = vmul.f32 -1.442695, %v1724_v9 }
 0x478   :  { %v2114_v61 = vpop.eup %2113 }
 0x479   :  { %v1766_v47 = vmul.f32 %v2114_v61, %v1758_v17  ;;  %v2116_v57 = vpop.eup %2115  ;;  %vm1771_vm6 = vweird.f32 %v2114_v61 }
 0x47a   :  { %v1759_v11 = vadd.f32 1.0, %v2116_v57  ;;  %vm1772_vm15 = vmor %vm1770_vm7, %vm1771_vm6 }
 0x47b   :  { %v1767_v14 = vsub.f32 1.0, %v1766_v47 }
 0x47c   :  { %2117 = vrcp.f32 %v1759_v11  ;;  %v1791_v3 = vand.u32 2147483648, %v1759_v11  ;;  %v1789_v6 = vand.u32 2147483647, %v1759_v11  ;;  %vm1785_vm2 = vweird.f32 %v1759_v11  ;;  %v1725_v37 = vpop.f32.mrf.mxu0 }
 0x47d   :  { %v1768_v43 = vmul.f32 %v2114_v61, %v1767_v14  ;;  %2119 = vpow2.f32 %v2084_v15  ;;  %v1726_v53 = vadd.f32 %v1725_v37, %v3408_v23 }
 0x47e   :  { %v1792_v29 = vor.u32 1.1754944e-38, %v1791_v3  ;;  %vm1790_vm4 = vcmp.eq.f32.partialorder %v1789_v6, 8.507059e+37 }
 0x47f   :  { %v1769_v49 = vadd.f32 %v2114_v61, %v1768_v43  ;;  %v2085_v19 = vmul.f32 -1.442695, %v1726_v53 }
 0x481   :  { %v1773_v55 = vsel %vm1772_vm15, %v2114_v61, %v1769_v49 }
 0x482   :  { %v1778_v54 = vsel %vm1775_vm0, %v1777_v46, %v1773_v55  ;;  %v2118_v51 = vpop.eup %2117  ;;  %v2146_v46 = vmov 0  }
 0x483   :  { %v1877_v60 = vrot.slane %v1778_v54, 1  ;;  %v1878_v24 = vrot.slane %v1778_v54, 2  ;;  %v1879_v25 = vrot.slane %v1778_v54, 3  ;;  %1920 = vst [vmem:[#allocation1] ss:$9 sm:$0xff] %v1778_v54  ;;  %v1880_v27 = vrot.slane %v1778_v54, 4  ;;  %v2120_v26 = vpop.eup %2119  ;;  %2102 = vset.pattern.permute.xlu0 %v2146_v46  ;;  %2103 = vset.pattern.permute.xlu1 %v2146_v46 }
 0x484   :  { %v1781_v42 = vmul.f32 %v2118_v51, %v1759_v11  ;;  %vm1786_vm1 = vweird.f32 %v2118_v51  ;;  %v1881_v39 = vrot.slane %v1778_v54, 5  ;;  %v1882_v63 = vrot.slane %v1778_v54, 6  ;;  %v1728_v34 = vpop.f32.mrf.mxu0  ;;  %2104 = vset.pattern.permute.xlu2 %v2146_v46 }
 0x485   :  { %1922 = vst [vmem:[#allocation1 + $0x1] ss:$9 sm:$0xff] %v1877_v60  ;;  %vm1787_vm3 = vmor %vm1785_vm2, %vm1786_vm1  ;;  %v1883_v16 = vrot.slane %v1778_v54, 7  ;;  %v1760_v13 = vadd.f32 1.0, %v2120_v26  ;;  %v1729_v17 = vadd.f32 %v1728_v34, %v3408_v23 }
 0x486   :  { %1924 = vst [vmem:[#allocation1 + $0x2] ss:$9 sm:$0xff] %v1878_v24  ;;  %v1782_v8 = vsub.f32 1.0, %v1781_v42 }
 0x487   :  { %1926 = vst [vmem:[#allocation1 + $0x3] ss:$9 sm:$0xff] %v1879_v25  ;;  %2121 = vrcp.f32 %v1760_v13  ;;  %v1806_v52 = vand.u32 2147483648, %v1760_v13  ;;  %v1804_v48 = vand.u32 2147483647, %v1760_v13  ;;  %vm1800_vm6 = vweird.f32 %v1760_v13 }
 0x488   :  { %1928 = vst [vmem:[#allocation1 + $0x4] ss:$9 sm:$0xff] %v1880_v27  ;;  %v1783_v56 = vmul.f32 %v2118_v51, %v1782_v8  ;;  %2123 = vpow2.f32 %v2085_v19  ;;  %v2086_v61 = vmul.f32 -1.442695, %v1729_v17 }
 0x489   :  { %v1807_v59 = vor.u32 1.1754944e-38, %v1806_v52  ;;  %vm1805_vm15 = vcmp.eq.f32.partialorder %v1804_v48, 8.507059e+37 }
 0x48a   :  { %v1784_v18 = vadd.f32 %v2118_v51, %v1783_v56 }
 0x48c   :  { %v1788_v41 = vsel %vm1787_vm3, %v2118_v51, %v1784_v18  ;;  %v1730_v36 = vpop.f32.mrf.mxu0 }
 0x48d   :  { %v1793_v4 = vsel %vm1790_vm4, %v1792_v29, %v1788_v41  ;;  %v2122_v62 = vpop.eup %2121  ;;  %v1731_v55 = vadd.f32 %v1730_v36, %v3408_v23 }
 0x48e   :  { %v1884_v5 = vrot.slane %v1793_v4, 1  ;;  %v1885_v10 = vrot.slane %v1793_v4, 2  ;;  %v1886_v32 = vrot.slane %v1793_v4, 3  ;;  %v1887_v20 = vrot.slane %v1793_v4, 4  ;;  %v2124_v12 = vpop.eup %2123 }
 0x48f   :  { %v3413_v21 = vld [vmem:[#allocation1] sm:$0xff]  ;;  %v1888_v28 = vrot.slane %v1793_v4, 5  ;;  %v1796_v30 = vmul.f32 %v2122_v62, %v1760_v13  ;;  %v1889_v44 = vrot.slane %v1793_v4, 6  ;;  %vm1801_vm5 = vweird.f32 %v2122_v62 }
 0x490   :  { %1930 = vst [vmem:[#allocation1] ss:$9 sm:$0xff] %v1881_v39  ;;  %v1761_v1 = vadd.f32 1.0, %v2124_v12  ;;  %vm1802_vm7 = vmor %vm1800_vm6, %vm1801_vm5  ;;  %v1890_v7 = vrot.slane %v1793_v4, 7  ;;  %1985 = vperm.xlu0 %2102, %v3413_v21   ;;  %v2087_v42 = vmul.f32 -1.442695, %v1731_v55 }
 0x491   :  { %1931 = vst [vmem:[#allocation1 + $0x1] ss:$9 sm:$0xff] %v1882_v63  ;;  %v1797_v2 = vsub.f32 1.0, %v1796_v30 }
 0x492   :  { %1932 = vst [vmem:[#allocation1 + $0x2] ss:$9 sm:$0xff] %v1883_v16  ;;  %2125 = vrcp.f32 %v1761_v1  ;;  %vm1815_vm1 = vweird.f32 %v1761_v1  ;;  %v1821_v49 = vand.u32 2147483648, %v1761_v1  ;;  %v1819_v24 = vand.u32 2147483647, %v1761_v1 }
 0x493   :  { %1933 = vst [vmem:[#allocation1 + $0x3] ss:$9 sm:$0xff] %v1793_v4  ;;  %v1798_v22 = vmul.f32 %v2122_v62, %v1797_v2  ;;  %2127 = vpow2.f32 %v2086_v61 }
 0x494   :  { %1934 = vst [vmem:[#allocation1 + $0x4] ss:$9 sm:$0xff] %v1884_v5  ;;  %v1822_v3 = vor.u32 1.1754944e-38, %v1821_v49  ;;  %vm1820_vm3 = vcmp.eq.f32.partialorder %v1819_v24, 8.507059e+37  ;;  %v1733_v6 = vpop.f32.mrf.mxu0 }
 0x495   :  { %v1799_v31 = vadd.f32 %v2122_v62, %v1798_v22  ;;  %v1734_v21 = vadd.f32 %v1733_v6, %v3408_v23 }
 0x497   :  { %v1803_v33 = vsel %vm1802_vm7, %v2122_v62, %v1799_v31 }
 0x498   :  { %v1808_v38 = vsel %vm1805_vm15, %v1807_v59, %v1803_v33  ;;  %v2126_v14 = vpop.eup %2125 }
 0x499   :  { %v1891_v50 = vrot.slane %v1808_v38, 1  ;;  %v1892_v35 = vrot.slane %v1808_v38, 2  ;;  %v1893_v47 = vrot.slane %v1808_v38, 3  ;;  %v1811_v58 = vmul.f32 %v2126_v14, %v1761_v1  ;;  %v2128_v11 = vpop.eup %2127 }
 0x49a   :  { %vm1816_vm0 = vweird.f32 %v2126_v14  ;;  %v1894_v54 = vrot.slane %v1808_v38, 4  ;;  %v1762_v25 = vadd.f32 1.0, %v2128_v11  ;;  %v1895_v27 = vrot.slane %v1808_v38, 5 }
 0x49b   :  { %v1935_v0 = vld [vmem:[#allocation1] sm:$0xff]  ;;  %v1812_v57 = vsub.f32 1.0, %v1811_v58  ;;  %vm1817_vm2 = vmor %vm1815_vm1, %vm1816_vm0  ;;  %v1896_v45 = vrot.slane %v1808_v38, 6  ;;  %v1897_v9 = vrot.slane %v1808_v38, 7 }
 0x49c   :  { %1936 = vst [vmem:[#allocation1] ss:$9 sm:$0xff] %v1885_v10  ;;  %1988 = vperm.xlu1 %2103, %v1935_v0   ;;  %2129 = vrcp.f32 %v1762_v25  ;;  %v1735_v13 = vpop.f32.mrf.mxu0  ;;  %v1836_v19 = vand.u32 2147483648, %v1762_v25  ;;  %vm1830_vm5 = vweird.f32 %v1762_v25  ;;  %v1834_v0 = vand.u32 2147483647, %v1762_v25 }
 0x49d   :  { %1937 = vst [vmem:[#allocation1 + $0x1] ss:$9 sm:$0xff] %v1886_v32  ;;  %v1813_v43 = vmul.f32 %v2126_v14, %v1812_v57  ;;  %2131 = vpow2.f32 %v2087_v42  ;;  %v2088_v32 = vmul.f32 -1.442695, %v1734_v21 }
 0x49e   :  { %1938 = vst [vmem:[#allocation1 + $0x2] ss:$9 sm:$0xff] %v1887_v20  ;;  %v1837_v62 = vor.u32 1.1754944e-38, %v1836_v19  ;;  %vm1835_vm7 = vcmp.eq.f32.partialorder %v1834_v0, 8.507059e+37 }
 0x49f   :  { %1939 = vst [vmem:[#allocation1 + $0x3] ss:$9 sm:$0xff] %v1888_v28  ;;  %v1814_v60 = vadd.f32 %v2126_v14, %v1813_v43 }
 0x4a0   :  { %1940 = vst [vmem:[#allocation1 + $0x4] ss:$9 sm:$0xff] %v1889_v44 }
 0x4a1   :  { %v1818_v8 = vsel %vm1817_vm2, %v2126_v14, %v1814_v60 }
 0x4a2   :  { %v1823_v56 = vsel %vm1820_vm3, %v1822_v3, %v1818_v8  ;;  %v2130_v15 = vpop.eup %2129 }
 0x4a3   :  { %v1826_v18 = vmul.f32 %v2130_v15, %v1762_v25  ;;  %v2132_v39 = vpop.eup %2131  ;;  %v1898_v63 = vrot.slane %v1823_v56, 1  ;;  %v1899_v41 = vrot.slane %v1823_v56, 2  ;;  %v1901_v5 = vrot.slane %v1823_v56, 4 }
 0x4a4   :  { %v1763_v26 = vadd.f32 1.0, %v2132_v39  ;;  %v1902_v37 = vrot.slane %v1823_v56, 5  ;;  %vm1831_vm4 = vweird.f32 %v2130_v15  ;;  %v1900_v10 = vrot.slane %v1823_v56, 3 }
 0x4a5   :  { %v1827_v29 = vsub.f32 1.0, %v1826_v18  ;;  %vm1832_vm6 = vmor %vm1830_vm5, %vm1831_vm4  ;;  %v1903_v22 = vrot.slane %v1823_v56, 6  ;;  %v1904_v12 = vrot.slane %v1823_v56, 7 }
 0x4a6   :  { %2133 = vrcp.f32 %v1763_v26  ;;  %v1851_v61 = vand.u32 2147483648, %v1763_v26  ;;  %vm1845_vm0 = vweird.f32 %v1763_v26 }
 0x4a7   :  { %v1941_v40 = vld [vmem:[#allocation1] sm:$0xff]  ;;  %v1828_v4 = vmul.f32 %v2130_v15, %v1827_v29  ;;  %2135 = vpow2.f32 %v2088_v32  ;;  %v2014_v29 = vlaneseq }
 0x4a8   :  { %1942 = vst [vmem:[#allocation1] ss:$9 sm:$0xff] %v1890_v7  ;;  %1991 = vperm.xlu2 %2104, %v1941_v40   ;;  %v1852_v57 = vor.u32 1.1754944e-38, %v1851_v61 }
 0x4a9   :  { %1943 = vst [vmem:[#allocation1 + $0x1] ss:$9 sm:$0xff] %v1808_v38  ;;  %v1829_v53 = vadd.f32 %v2130_v15, %v1828_v4  ;;  %v2015_v21 = vand.u32 127, %v2014_v29 }
 0x4aa   :  { %1944 = vst [vmem:[#allocation1 + $0x2] ss:$9 sm:$0xff] %v1891_v50 }
 0x4ab   :  { %1945 = vst [vmem:[#allocation1 + $0x3] ss:$9 sm:$0xff] %v1892_v35  ;;  %v1833_v23 = vsel %vm1832_vm6, %v2130_v15, %v1829_v53 }
 0x4ac   :  { %1946 = vst [vmem:[#allocation1 + $0x4] ss:$9 sm:$0xff] %v1893_v47  ;;  %v1838_v20 = vsel %vm1835_vm7, %v1837_v62, %v1833_v23  ;;  %v2134_v28 = vpop.eup %2133  ;;  %v1849_v47 = vand.u32 2147483647, %v1763_v26  ;;  %vm2036_vm7 = vcmask 39936  }
 0x4ad   :  { %v1905_v30 = vrot.slane %v1838_v20, 1  ;;  %v2136_v2 = vpop.eup %2135  ;;  %v1906_v52 = vrot.slane %v1838_v20, 2  ;;  %v1841_v48 = vmul.f32 %v2134_v28, %v1763_v26  ;;  %v1907_v34 = vrot.slane %v1838_v20, 3 }
 0x4ae   :  { %v1764_v31 = vadd.f32 1.0, %v2136_v2  ;;  %v1908_v33 = vrot.slane %v1838_v20, 4  ;;  %v1909_v38 = vrot.slane %v1838_v20, 5  ;;  %v1910_v40 = vrot.slane %v1838_v20, 6 }
 0x4af   :  { %v1842_v1 = vsub.f32 1.0, %v1841_v48  ;;  %vm1846_vm15 = vweird.f32 %v2134_v28  ;;  %v1911_v35 = vrot.slane %v1838_v20, 7  ;;  %vm1850_vm2 = vcmp.eq.f32.partialorder %v1849_v47, 8.507059e+37 }
 0x4b0   :  { %2137 = vrcp.f32 %v1764_v31  ;;  %vm1847_vm1 = vmor %vm1845_vm0, %vm1846_vm15  ;;  %v1866_v25 = vand.u32 2147483648, %v1764_v31  ;;  %vm1860_vm4 = vweird.f32 %v1764_v31 }
 0x4b1   :  { %v1843_v59 = vmul.f32 %v2134_v28, %v1842_v1 }
 0x4b2   :  { %v1867_v42 = vor.u32 1.1754944e-38, %v1866_v25 }
 0x4b3   :  { %v1947_v51 = vld [vmem:[#allocation1] sm:$0xff]  ;;  %v1844_v50 = vadd.f32 %v2134_v28, %v1843_v59 }
 0x4b4   :  { %1948 = vst [vmem:[#allocation1] ss:$9 sm:$0xff] %v1894_v54  ;;  %1994 = vperm.xlu1 %2103, %v1947_v51  }
 0x4b5   :  { %1949 = vst [vmem:[#allocation1 + $0x1] ss:$9 sm:$0xff] %v1895_v27  ;;  %v1848_v58 = vsel %vm1847_vm1, %v2134_v28, %v1844_v50  ;;  %v1864_v27 = vand.u32 2147483647, %v1764_v31 }
 0x4b6   :  { %1950 = vst [vmem:[#allocation1 + $0x2] ss:$9 sm:$0xff] %v1896_v45  ;;  %v2138_v17 = vpop.eup %2137  ;;  %v1853_v43 = vsel %vm1850_vm2, %v1852_v57, %v1848_v58 }
 0x4b7   :  { %1951 = vst [vmem:[#allocation1 + $0x3] ss:$9 sm:$0xff] %v1897_v9  ;;  %v1856_v14 = vmul.f32 %v2138_v17, %v1764_v31  ;;  %v1912_v11 = vrot.slane %v1853_v43, 1  ;;  %v1913_v46 = vrot.slane %v1853_v43, 2  ;;  %v1914_v54 = vrot.slane %v1853_v43, 3 }
 0x4b8   :  { %1952 = vst [vmem:[#allocation1 + $0x4] ss:$9 sm:$0xff] %v1823_v56  ;;  %v1915_v60 = vrot.slane %v1853_v43, 4  ;;  %vm1861_vm3 = vweird.f32 %v2138_v17  ;;  %v1916_v45 = vrot.slane %v1853_v43, 5  ;;  %vm1865_vm6 = vcmp.eq.f32.partialorder %v1864_v27, 8.507059e+37 }
 0x4b9   :  { %v1857_v36 = vsub.f32 1.0, %v1856_v14  ;;  %vm1862_vm5 = vmor %vm1860_vm4, %vm1861_vm3  ;;  %v1917_v8 = vrot.slane %v1853_v43, 6  ;;  %v1918_v56 = vrot.slane %v1853_v43, 7 }
 0x4bb   :  { %v1858_v55 = vmul.f32 %v2138_v17, %v1857_v36 }
 0x4bd   :  { %v1859_v24 = vadd.f32 %v2138_v17, %v1858_v55 }
 0x4bf   :  { %v1953_v16 = vld [vmem:[#allocation1] sm:$0xff]  ;;  %v1863_v51 = vsel %vm1862_vm5, %v2138_v17, %v1859_v24 }
 0x4c0   :  { %1954 = vst [vmem:[#allocation1] ss:$9 sm:$0xff] %v1898_v63  ;;  %1997 = vperm.xlu2 %2104, %v1953_v16   ;;  %v1868_v9 = vsel %vm1865_vm6, %v1867_v42, %v1863_v51 }
 0x4c1   :  { %1955 = vst [vmem:[#allocation1 + $0x1] ss:$9 sm:$0xff] %v1899_v41  ;;  %v1919_v6 = vrot.slane %v1868_v9, 1 }
 0x4c2   :  { %1957 = vst [vmem:[#allocation1 + $0x3] ss:$9 sm:$0xff] %v1901_v5 }
 0x4c3   :  { %1958 = vst [vmem:[#allocation1 + $0x4] ss:$9 sm:$0xff] %v1902_v37 }
 0x4c4   :  { %1956 = vst [vmem:[#allocation1 + $0x2] ss:$9 sm:$0xff] %v1900_v10 }
 0x4cb   :  { %v1959_v44 = vld [vmem:[#allocation1] sm:$0xff] }
 0x4cc   :  { %1962 = vst [vmem:[#allocation1 + $0x2] ss:$9 sm:$0xff] %v1838_v20  ;;  %2000 = vperm.xlu0 %2102, %v1959_v44  }
 0x4cd   :  { %1963 = vst [vmem:[#allocation1 + $0x3] ss:$9 sm:$0xff] %v1905_v30 }
 0x4ce   :  { %1964 = vst [vmem:[#allocation1 + $0x4] ss:$9 sm:$0xff] %v1906_v52 }
 0x4cf   :  { %1960 = vst [vmem:[#allocation1] ss:$9 sm:$0xff] %v1903_v22 }
 0x4d0   :  { %1961 = vst [vmem:[#allocation1 + $0x1] ss:$9 sm:$0xff] %v1904_v12 }
 0x4d7   :  { %v1965_v7 = vld [vmem:[#allocation1] sm:$0xff] }
 0x4d8   :  { %2003 = vperm.xlu1 %2103, %v1965_v7   ;;  %1966 = vst [vmem:[#allocation1] ss:$9 sm:$0xff] %v1907_v34 }
 0x4d9   :  { %1967 = vst [vmem:[#allocation1 + $0x1] ss:$9 sm:$0xff] %v1908_v33 }
 0x4da   :  { %1968 = vst [vmem:[#allocation1 + $0x2] ss:$9 sm:$0xff] %v1909_v38 }
 0x4db   :  { %1969 = vst [vmem:[#allocation1 + $0x3] ss:$9 sm:$0xff] %v1910_v40 }
 0x4dc   :  { %1970 = vst [vmem:[#allocation1 + $0x4] ss:$9 sm:$0xff] %v1911_v35 }
 0x4e3   :  { %v1971_v49 = vld [vmem:[#allocation1] sm:$0xff] }
 0x4e4   :  { %2006 = vperm.xlu2 %2104, %v1971_v49   ;;  %1972 = vst [vmem:[#allocation1] ss:$9 sm:$0xff] %v1853_v43 }
 0x4e5   :  { %1973 = vst [vmem:[#allocation1 + $0x1] ss:$9 sm:$0xff] %v1912_v11 }
 0x4e6   :  { %1974 = vst [vmem:[#allocation1 + $0x2] ss:$9 sm:$0xff] %v1913_v46 }
 0x4e7   :  { %1975 = vst [vmem:[#allocation1 + $0x3] ss:$9 sm:$0xff] %v1914_v54 }
 0x4e8   :  { %1976 = vst [vmem:[#allocation1 + $0x4] ss:$9 sm:$0xff] %v1915_v60 }
 0x4ef   :  { %v1977_v3 = vld [vmem:[#allocation1] sm:$0xff] }
 0x4f0   :  { %2009 = vperm.xlu0 %2102, %v1977_v3   ;;  %1978 = vst [vmem:[#allocation1] ss:$9 sm:$0xff] %v1916_v45 }
 0x4f1   :  { %1979 = vst [vmem:[#allocation1 + $0x1] ss:$9 sm:$0xff] %v1917_v8 }
 0x4f2   :  { %1980 = vst [vmem:[#allocation1 + $0x2] ss:$9 sm:$0xff] %v1918_v56 }
 0x4f3   :  { %1981 = vst [vmem:[#allocation1 + $0x3] ss:$9 sm:$0xff] %v1868_v9 }
 0x4f4   :  { %1982 = vst [vmem:[#allocation1 + $0x4] ss:$9 sm:$0xff] %v1919_v6 }
 0x4fb   :  { %v1983_v15 = vld [vmem:[#allocation1] sm:$0xff] }
 0x4fc   :  { %2012 = vperm.xlu1 %2103, %v1983_v15  }
 0x502   :  { %v1992_v18 = vpop.permute.xlu2 %1991  ;;  %v1986_v63 = vpop.permute.xlu0 %1985 }
 0x503   :  { %v2016_v5 = vperm.slane %v1986_v63, %v2015_v21  ;;  %v2018_v37 = vperm.slane %v1992_v18, %v2015_v21 }
 0x50e   :  { %v1989_v39 = vpop.permute.xlu1 %1988 }
 0x50f   :  { %v2017_v41 = vperm.slane %v1989_v39, %v2015_v21 }
 0x511   :  { %v2026_v26 = vsel %vm1426_vm8, %v2017_v41, %v2016_v5 }
 0x512   :  { %v2027_v10 = vsel %vm1428_vm9, %v2018_v37, %v2026_v26  ;;  %vm2038_vm9 = vcmask 33792  }
 0x51a   :  { %v1998_v16 = vpop.permute.xlu2 %1997 }
 0x51b   :  { %v2020_v0 = vperm.slane %v1998_v16, %v2015_v21 }
 0x526   :  { %v1995_v4 = vpop.permute.xlu1 %1994 }
 0x527   :  { %v2019_v13 = vperm.slane %v1995_v4, %v2015_v21 }
 0x529   :  { %v2028_v19 = vsel %vm1430_vm10, %v2019_v13, %v2027_v10 }
 0x52a   :  { %v2029_v20 = vsel %vm1432_vm11, %v2020_v0, %v2028_v19 }
 0x53e   :  { %v2001_v53 = vpop.permute.xlu0 %2000  ;;  %v2007_v23 = vpop.permute.xlu2 %2006 }
 0x53f   :  { %v2021_v32 = vperm.slane %v2001_v53, %v2015_v21  ;;  %v2023_v30 = vperm.slane %v2007_v23, %v2015_v21 }
 0x541   :  { %v2030_v44 = vsel %vm1434_vm12, %v2021_v32, %v2029_v20 }
 0x54a   :  { %v2004_v62 = vpop.permute.xlu1 %2003 }
 0x54b   :  { %v2022_v28 = vperm.slane %v2004_v62, %v2015_v21 }
 0x54d   :  { %v2031_v2 = vsel %vm1436_vm13, %v2022_v28, %v2030_v44 }
 0x54e   :  { %v2032_v52 = vsel %vm1438_vm14, %v2023_v30, %v2031_v2 }
 0x54f   :  { %2037 = vst.msk [vmem:[%s3442_s7] sm:$0xff] %vm2036_vm7, %v2032_v52 }
 0x562   :  { %v2010_v22 = vpop.permute.xlu0 %2009 }
 0x563   :  { %v2024_v12 = vperm.slane %v2010_v22, %v2015_v21 }
 0x56e   :  { %v2013_v48 = vpop.permute.xlu1 %2012 }
 0x56f   :  { %v2025_v31 = vperm.slane %v2013_v48, %v2015_v21 }
 0x571   :  { %v2033_v1 = vsel %vm1426_vm8, %v2025_v31, %v2024_v12 }
 0x572   :  { %2039 = vst.msk [vmem:[%s3442_s7 + $0x8] sm:$0x3] %vm2038_vm9, %v2033_v1 }

</bundles_post_ra>
